<compile_context>
chip_gen: v5e
topology: v5e:2x2
jax: 0.10.0
libtpu: 0.0.40
codegen_flags: <defaults>
</compile_context>

<pallas_src>
import jax
import jax.numpy as jnp
from jax import lax
from jax.experimental import pallas as pl
from jax.experimental.pallas import tpu as pltpu


def _round_up(x, m):
    return (x + m - 1) // m * m


def _fused_gnn_kernel(adj_ref, wgt_ref, x_ref, mask_ref, w_ref, o_ref,
                      h_ref, a_ref):
    """Fused multi-layer GNN.  Grid axis 0 = layer index (sequential).

    Per layer:  h <- relu( A @ ((h * mask) @ W_l) ) * mask
    which (for a 0/1 mask) equals the reference's
    index_select + weighted neighbor-sum with repeated mask multiplies.
    """
    layer = pl.program_id(0)
    mask = mask_ref[...]                                    # [N, 1]  f32 (0/1)

    @pl.when(layer == 0)
    def _init():
        # Build A[i, m] = sum_k wgt[i,k] * (adj[i,k] == m) once; it is
        # graph-only data shared by every layer.
        adj = adj_ref[...]                                  # [N, K] int32
        wgt = wgt_ref[...]                                  # [N, K] f32
        n = a_ref.shape[0]
        lane_ids = lax.broadcasted_iota(jnp.int32, (n, n), 1)
        # K is small and static -> unrolled; k=0 folded into the init.
        acc = jnp.where(adj[:, 0:1] == lane_ids, wgt[:, 0:1], 0.0)
        for kk in range(1, adj_ref.shape[1]):
            acc = acc + jnp.where(adj[:, kk:kk + 1] == lane_ids,
                                  wgt[:, kk:kk + 1], 0.0)
        a_ref[...] = acc
        h_ref[...] = x_ref[...]

    # ---- one GNN layer (euclidean: log/exp maps are identity, eval dropout) --
    h = h_ref[...] * mask                                   # node_repr * mask
    msg = jnp.dot(h, w_ref[0], preferred_element_type=jnp.float32)
    combined = jnp.dot(a_ref[...], msg,
                       preferred_element_type=jnp.float32)  # A @ msg
    out = jnp.maximum(combined, 0.0) * mask                 # relu + mask
    h_ref[...] = out                                        # carry to next layer

    @pl.when(layer == pl.num_programs(0) - 1)
    def _finalize():
        o_ref[...] = out


def riemannian_gnn_forward(node_repr, adj_list, edge_weight, mask, msg_weights):
    """Runs args.gnn_layer layers in a single fused Pallas kernel."""
    n, e = node_repr.shape
    k = adj_list.shape[1]
    num_layers = len(msg_weights)

    # Lane-dense padding: E -> multiple of 128 (output lane dim / x@W depth),
    # N -> multiple of 128 (A lane dim / A@msg contraction depth).
    ep = _round_up(e, 128)
    npad = _round_up(n, 128)

    x_p = jnp.zeros((npad, ep), jnp.float32).at[:n, :e].set(
        node_repr.astype(jnp.float32))
    adj_p = jnp.zeros((npad, k), jnp.int32).at[:n, :].set(
        adj_list.astype(jnp.int32))
    wgt_p = jnp.zeros((npad, k), jnp.float32).at[:n, :].set(
        edge_weight.astype(jnp.float32))
    mask_p = jnp.zeros((npad, 1), jnp.float32).at[:n, :].set(
        mask.astype(jnp.float32))
    w_stack = jnp.stack([w.astype(jnp.float32) for w in msg_weights])
    w_p = jnp.zeros((num_layers, ep, ep), jnp.float32).at[:, :e, :e].set(w_stack)

    grid_spec = pltpu.PrefetchScalarGridSpec(
        num_scalar_prefetch=0,
        grid=(num_layers,),
        in_specs=[
            pl.BlockSpec((npad, k), lambda l: (0, 0)),        # adj_list
            pl.BlockSpec((npad, k), lambda l: (0, 0)),        # edge weights
            pl.BlockSpec((npad, ep), lambda l: (0, 0)),       # node_repr
            pl.BlockSpec((npad, 1), lambda l: (0, 0)),        # mask
            pl.BlockSpec((1, ep, ep), lambda l: (l, 0, 0)),   # per-layer W
        ],
        out_specs=pl.BlockSpec((npad, ep), lambda l: (0, 0)),
        scratch_shapes=[
            pltpu.VMEM((npad, ep), jnp.float32),    # inter-layer node_repr
            pltpu.VMEM((npad, npad), jnp.float32),  # dense weighted adjacency A
        ],
    )

    flops = (num_layers * (2 * npad * ep * ep + 2 * npad * npad * ep)
             + 2 * k * npad * npad)
    bytes_accessed = 4 * (2 * npad * k + 2 * npad * ep + npad
                          + num_layers * ep * ep)

    out = pl.pallas_call(
        _fused_gnn_kernel,
        out_shape=jax.ShapeDtypeStruct((npad, ep), jnp.float32),
        grid_spec=grid_spec,
        compiler_params=pltpu.CompilerParams(
            dimension_semantics=("arbitrary",),
            vmem_limit_bytes=32 * 1024 * 1024),
        cost_estimate=pl.CostEstimate(flops=flops, transcendentals=0,
                                      bytes_accessed=bytes_accessed),
    )(adj_p, wgt_p, x_p, mask_p, w_p)

    return out[:n, :e]


def _reference(node_repr, adj_list, edge_weight, mask, msg_weights):
    """Pure-JAX mirror of the PyTorch forward (euclidean, eval dropout)."""
    n, k = adj_list.shape
    h = node_repr
    for w in msg_weights:
        h = h * mask
        msg = jnp.dot(h, w, precision=jax.lax.Precision.HIGHEST) * mask
        neigh = jnp.take(msg, adj_list.reshape(-1), axis=0).reshape(n, k, -1)
        combined = jnp.sum(edge_weight[:, :, None] * neigh, axis=1)
        combined = combined * mask
        h = combined * mask
        h = jnp.maximum(h, 0.0) * mask
    return h


if __name__ == "__main__":
    # small shapes: node_num=64, embed_size=32, max_neighbor=8, gnn_layer=2
    N, E, K, L = 64, 32, 8, 2

    key = jax.random.PRNGKey(0)
    k1, k2, k3, k4 = jax.random.split(key, 4)
    node_repr = jax.random.normal(k1, (N, E), dtype=jnp.float32)
    adj_list = jax.random.randint(k2, (N, K), 0, N, dtype=jnp.int32)
    edge_weight = jax.random.uniform(k3, (N, K), dtype=jnp.float32)
    mask = (jax.random.uniform(k4, (N, 1)) > 0.1).astype(jnp.float32)

    # deterministic xavier-uniform-style init of the msg_0_weight ParameterList
    limit = (6.0 / (E + E)) ** 0.5
    wkeys = jax.random.split(jax.random.PRNGKey(42), L)
    msg_weights = [
        jax.random.uniform(wk, (E, E), minval=-limit, maxval=limit,
                           dtype=jnp.float32)
        for wk in wkeys
    ]

    out = riemannian_gnn_forward(node_repr, adj_list, edge_weight, mask,
                                 msg_weights)
    jax.block_until_ready(out)
    assert out.shape == (N, E) and out.dtype == jnp.float32

    ref = _reference(node_repr, adj_list, edge_weight, mask, msg_weights)
    max_err = float(jnp.max(jnp.abs(out - ref)))
    assert jnp.allclose(out, ref, rtol=1e-3, atol=1e-3), max_err
    print("KERNEL_OK")
</pallas_src>

<mosaic_0001>
module attributes {stable_mosaic.version = 11 : i64} {
  func.func @_fused_gnn_kernel(%arg0: i32, %arg1: memref<128x8xi32, #tpu.memory_space<vmem>>, %arg2: memref<128x8xf32, #tpu.memory_space<vmem>>, %arg3: memref<128x128xf32, #tpu.memory_space<vmem>>, %arg4: memref<128x1xf32, #tpu.memory_space<vmem>>, %arg5: memref<1x128x128xf32, #tpu.memory_space<vmem>>, %arg6: memref<128x128xf32, #tpu.memory_space<vmem>>, %arg7: memref<128x128xf32, #tpu.memory_space<vmem>>, %arg8: memref<128x128xf32, #tpu.memory_space<vmem>>) attributes {dimension_semantics = [#tpu.dimension_semantics<arbitrary>], iteration_bounds = array<i64: 2>, scalar_prefetch = 0 : i64, scratch_operands = 2 : i64, tpu.core_type = #tpu.core_type<tc>, window_params = [{pipeline_mode = #tpu.pipeline_mode<synchronous>, transform_indices = @transform_0, window_bounds = array<i64: 128, 8>}, {pipeline_mode = #tpu.pipeline_mode<synchronous>, transform_indices = @transform_1, window_bounds = array<i64: 128, 8>}, {pipeline_mode = #tpu.pipeline_mode<synchronous>, transform_indices = @transform_2, window_bounds = array<i64: 128, 128>}, {pipeline_mode = #tpu.pipeline_mode<synchronous>, transform_indices = @transform_3, window_bounds = array<i64: 128, 1>}, {transform_indices = @transform_4, window_bounds = array<i64: 1, 128, 128>}, {pipeline_mode = #tpu.pipeline_mode<synchronous>, transform_indices = @transform_5, window_bounds = array<i64: 128, 128>}]} {
    %c0 = arith.constant 0 : index
    %c0_0 = arith.constant 0 : index
    %0 = vector.load %arg4[%c0, %c0_0] : memref<128x1xf32, #tpu.memory_space<vmem>>, vector<128x1xf32>
    %c0_i32 = arith.constant 0 : i32
    %1 = arith.cmpi eq, %arg0, %c0_i32 : i32
    %2 = arith.extui %1 : i1 to i32
    %c0_i32_1 = arith.constant 0 : i32
    %3 = arith.cmpi ne, %2, %c0_i32_1 : i32
    scf.if %3 {
      %c0_14 = arith.constant 0 : index
      %c0_15 = arith.constant 0 : index
      %20 = vector.load %arg1[%c0_14, %c0_15] : memref<128x8xi32, #tpu.memory_space<vmem>>, vector<128x8xi32>
      %c0_16 = arith.constant 0 : index
      %c0_17 = arith.constant 0 : index
      %21 = vector.load %arg2[%c0_16, %c0_17] : memref<128x8xf32, #tpu.memory_space<vmem>>, vector<128x8xf32>
      %22 = tpu.iota {dimensions = array<i32: 1>} : vector<128x128xi32>
      %23 = vector.extract_strided_slice %20 {offsets = [0, 0], sizes = [128, 1], strides = [1, 1]} : vector<128x8xi32> to vector<128x1xi32>
      %24 = vector.broadcast %23 : vector<128x1xi32> to vector<128x128xi32>
      %25 = arith.cmpi eq, %24, %22 : vector<128x128xi32>
      %26 = vector.extract_strided_slice %21 {offsets = [0, 0], sizes = [128, 1], strides = [1, 1]} : vector<128x8xf32> to vector<128x1xf32>
      %cst_18 = arith.constant 0.000000e+00 : f32
      %27 = vector.shape_cast %26 : vector<128x1xf32> to vector<128x1xf32>
      %28 = vector.broadcast %27 : vector<128x1xf32> to vector<128x128xf32>
      %29 = vector.broadcast %cst_18 : f32 to vector<128x128xf32>
      %30 = arith.select %25, %28, %29 : vector<128x128xi1>, vector<128x128xf32>
      %31 = vector.extract_strided_slice %20 {offsets = [0, 1], sizes = [128, 1], strides = [1, 1]} : vector<128x8xi32> to vector<128x1xi32>
      %32 = vector.broadcast %31 : vector<128x1xi32> to vector<128x128xi32>
      %33 = arith.cmpi eq, %32, %22 : vector<128x128xi32>
      %34 = vector.extract_strided_slice %21 {offsets = [0, 1], sizes = [128, 1], strides = [1, 1]} : vector<128x8xf32> to vector<128x1xf32>
      %cst_19 = arith.constant 0.000000e+00 : f32
      %35 = vector.shape_cast %34 : vector<128x1xf32> to vector<128x1xf32>
      %36 = vector.broadcast %35 : vector<128x1xf32> to vector<128x128xf32>
      %37 = vector.broadcast %cst_19 : f32 to vector<128x128xf32>
      %38 = arith.select %33, %36, %37 : vector<128x128xi1>, vector<128x128xf32>
      %39 = arith.addf %30, %38 : vector<128x128xf32>
      %40 = vector.extract_strided_slice %20 {offsets = [0, 2], sizes = [128, 1], strides = [1, 1]} : vector<128x8xi32> to vector<128x1xi32>
      %41 = vector.broadcast %40 : vector<128x1xi32> to vector<128x128xi32>
      %42 = arith.cmpi eq, %41, %22 : vector<128x128xi32>
      %43 = vector.extract_strided_slice %21 {offsets = [0, 2], sizes = [128, 1], strides = [1, 1]} : vector<128x8xf32> to vector<128x1xf32>
      %cst_20 = arith.constant 0.000000e+00 : f32
      %44 = vector.shape_cast %43 : vector<128x1xf32> to vector<128x1xf32>
      %45 = vector.broadcast %44 : vector<128x1xf32> to vector<128x128xf32>
      %46 = vector.broadcast %cst_20 : f32 to vector<128x128xf32>
      %47 = arith.select %42, %45, %46 : vector<128x128xi1>, vector<128x128xf32>
      %48 = arith.addf %39, %47 : vector<128x128xf32>
      %49 = vector.extract_strided_slice %20 {offsets = [0, 3], sizes = [128, 1], strides = [1, 1]} : vector<128x8xi32> to vector<128x1xi32>
      %50 = vector.broadcast %49 : vector<128x1xi32> to vector<128x128xi32>
      %51 = arith.cmpi eq, %50, %22 : vector<128x128xi32>
      %52 = vector.extract_strided_slice %21 {offsets = [0, 3], sizes = [128, 1], strides = [1, 1]} : vector<128x8xf32> to vector<128x1xf32>
      %cst_21 = arith.constant 0.000000e+00 : f32
      %53 = vector.shape_cast %52 : vector<128x1xf32> to vector<128x1xf32>
      %54 = vector.broadcast %53 : vector<128x1xf32> to vector<128x128xf32>
      %55 = vector.broadcast %cst_21 : f32 to vector<128x128xf32>
      %56 = arith.select %51, %54, %55 : vector<128x128xi1>, vector<128x128xf32>
      %57 = arith.addf %48, %56 : vector<128x128xf32>
      %58 = vector.extract_strided_slice %20 {offsets = [0, 4], sizes = [128, 1], strides = [1, 1]} : vector<128x8xi32> to vector<128x1xi32>
      %59 = vector.broadcast %58 : vector<128x1xi32> to vector<128x128xi32>
      %60 = arith.cmpi eq, %59, %22 : vector<128x128xi32>
      %61 = vector.extract_strided_slice %21 {offsets = [0, 4], sizes = [128, 1], strides = [1, 1]} : vector<128x8xf32> to vector<128x1xf32>
      %cst_22 = arith.constant 0.000000e+00 : f32
      %62 = vector.shape_cast %61 : vector<128x1xf32> to vector<128x1xf32>
      %63 = vector.broadcast %62 : vector<128x1xf32> to vector<128x128xf32>
      %64 = vector.broadcast %cst_22 : f32 to vector<128x128xf32>
      %65 = arith.select %60, %63, %64 : vector<128x128xi1>, vector<128x128xf32>
      %66 = arith.addf %57, %65 : vector<128x128xf32>
      %67 = vector.extract_strided_slice %20 {offsets = [0, 5], sizes = [128, 1], strides = [1, 1]} : vector<128x8xi32> to vector<128x1xi32>
      %68 = vector.broadcast %67 : vector<128x1xi32> to vector<128x128xi32>
      %69 = arith.cmpi eq, %68, %22 : vector<128x128xi32>
      %70 = vector.extract_strided_slice %21 {offsets = [0, 5], sizes = [128, 1], strides = [1, 1]} : vector<128x8xf32> to vector<128x1xf32>
      %cst_23 = arith.constant 0.000000e+00 : f32
      %71 = vector.shape_cast %70 : vector<128x1xf32> to vector<128x1xf32>
      %72 = vector.broadcast %71 : vector<128x1xf32> to vector<128x128xf32>
      %73 = vector.broadcast %cst_23 : f32 to vector<128x128xf32>
      %74 = arith.select %69, %72, %73 : vector<128x128xi1>, vector<128x128xf32>
      %75 = arith.addf %66, %74 : vector<128x128xf32>
      %76 = vector.extract_strided_slice %20 {offsets = [0, 6], sizes = [128, 1], strides = [1, 1]} : vector<128x8xi32> to vector<128x1xi32>
      %77 = vector.broadcast %76 : vector<128x1xi32> to vector<128x128xi32>
      %78 = arith.cmpi eq, %77, %22 : vector<128x128xi32>
      %79 = vector.extract_strided_slice %21 {offsets = [0, 6], sizes = [128, 1], strides = [1, 1]} : vector<128x8xf32> to vector<128x1xf32>
      %cst_24 = arith.constant 0.000000e+00 : f32
      %80 = vector.shape_cast %79 : vector<128x1xf32> to vector<128x1xf32>
      %81 = vector.broadcast %80 : vector<128x1xf32> to vector<128x128xf32>
      %82 = vector.broadcast %cst_24 : f32 to vector<128x128xf32>
      %83 = arith.select %78, %81, %82 : vector<128x128xi1>, vector<128x128xf32>
      %84 = arith.addf %75, %83 : vector<128x128xf32>
      %85 = vector.extract_strided_slice %20 {offsets = [0, 7], sizes = [128, 1], strides = [1, 1]} : vector<128x8xi32> to vector<128x1xi32>
      %86 = vector.broadcast %85 : vector<128x1xi32> to vector<128x128xi32>
      %87 = arith.cmpi eq, %86, %22 : vector<128x128xi32>
      %88 = vector.extract_strided_slice %21 {offsets = [0, 7], sizes = [128, 1], strides = [1, 1]} : vector<128x8xf32> to vector<128x1xf32>
      %cst_25 = arith.constant 0.000000e+00 : f32
      %89 = vector.shape_cast %88 : vector<128x1xf32> to vector<128x1xf32>
      %90 = vector.broadcast %89 : vector<128x1xf32> to vector<128x128xf32>
      %91 = vector.broadcast %cst_25 : f32 to vector<128x128xf32>
      %92 = arith.select %87, %90, %91 : vector<128x128xi1>, vector<128x128xf32>
      %93 = arith.addf %84, %92 : vector<128x128xf32>
      %c0_26 = arith.constant 0 : index
      %c0_27 = arith.constant 0 : index
      %94 = vector.load %arg8[%c0_26, %c0_27] : memref<128x128xf32, #tpu.memory_space<vmem>>, vector<128x128xf32>
      tpu.vector_store %arg8[%c0_26, %c0_27], %93 {strides = array<i32>} : memref<128x128xf32, #tpu.memory_space<vmem>>, vector<128x128xf32>,
      %c0_28 = arith.constant 0 : index
      %c0_29 = arith.constant 0 : index
      %95 = vector.load %arg3[%c0_28, %c0_29] : memref<128x128xf32, #tpu.memory_space<vmem>>, vector<128x128xf32>
      %c0_30 = arith.constant 0 : index
      %c0_31 = arith.constant 0 : index
      %96 = vector.load %arg7[%c0_30, %c0_31] : memref<128x128xf32, #tpu.memory_space<vmem>>, vector<128x128xf32>
      tpu.vector_store %arg7[%c0_30, %c0_31], %95 {strides = array<i32>} : memref<128x128xf32, #tpu.memory_space<vmem>>, vector<128x128xf32>,
    } else {
    }
    %c0_2 = arith.constant 0 : index
    %c0_3 = arith.constant 0 : index
    %4 = vector.load %arg7[%c0_2, %c0_3] : memref<128x128xf32, #tpu.memory_space<vmem>>, vector<128x128xf32>
    %5 = vector.broadcast %0 : vector<128x1xf32> to vector<128x128xf32>
    %6 = arith.mulf %4, %5 : vector<128x128xf32>
    %c0_4 = arith.constant 0 : index
    %c0_5 = arith.constant 0 : index
    %c0_6 = arith.constant 0 : index
    %7 = vector.load %arg5[%c0_4, %c0_5, %c0_6] : memref<1x128x128xf32, #tpu.memory_space<vmem>>, vector<1x128x128xf32>
    %8 = vector.shape_cast %7 : vector<1x128x128xf32> to vector<128x128xf32>
    %cst = arith.constant dense<0.000000e+00> : vector<128x128xf32>
    %9 = tpu.matmul %6, %8, %cst {dimension_numbers = #tpu.dot_dimension_numbers<[1], [0], [0], [1], [0, 0, 1, 1], [], []>} : vector<128x128xf32>, vector<128x128xf32>, vector<128x128xf32> -> vector<128x128xf32>
    %c0_7 = arith.constant 0 : index
    %c0_8 = arith.constant 0 : index
    %10 = vector.load %arg8[%c0_7, %c0_8] : memref<128x128xf32, #tpu.memory_space<vmem>>, vector<128x128xf32>
    %cst_9 = arith.constant dense<0.000000e+00> : vector<128x128xf32>
    %11 = tpu.matmul %10, %9, %cst_9 {dimension_numbers = #tpu.dot_dimension_numbers<[1], [0], [0], [1], [0, 0, 1, 1], [], []>} : vector<128x128xf32>, vector<128x128xf32>, vector<128x128xf32> -> vector<128x128xf32>
    %cst_10 = arith.constant 0.000000e+00 : f32
    %12 = vector.broadcast %cst_10 : f32 to vector<128x128xf32>
    %13 = arith.maximumf %11, %12 : vector<128x128xf32>
    %14 = vector.broadcast %0 : vector<128x1xf32> to vector<128x128xf32>
    %15 = arith.mulf %13, %14 : vector<128x128xf32>
    %c0_11 = arith.constant 0 : index
    %c0_12 = arith.constant 0 : index
    %16 = vector.load %arg7[%c0_11, %c0_12] : memref<128x128xf32, #tpu.memory_space<vmem>>, vector<128x128xf32>
    tpu.vector_store %arg7[%c0_11, %c0_12], %15 {strides = array<i32>} : memref<128x128xf32, #tpu.memory_space<vmem>>, vector<128x128xf32>,
    %c1_i32 = arith.constant 1 : i32
    %17 = arith.cmpi eq, %arg0, %c1_i32 : i32
    %18 = arith.extui %17 : i1 to i32
    %c0_i32_13 = arith.constant 0 : i32
    %19 = arith.cmpi ne, %18, %c0_i32_13 : i32
    scf.if %19 {
      %c0_14 = arith.constant 0 : index
      %c0_15 = arith.constant 0 : index
      %20 = vector.load %arg6[%c0_14, %c0_15] : memref<128x128xf32, #tpu.memory_space<vmem>>, vector<128x128xf32>
      tpu.vector_store %arg6[%c0_14, %c0_15], %15 {strides = array<i32>} : memref<128x128xf32, #tpu.memory_space<vmem>>, vector<128x128xf32>,
    } else {
    }
    return
  }
  func.func @transform_0(%arg0: i32) -> (i32, i32) {
    %c0_i32 = arith.constant 0 : i32
    %c0_i32_0 = arith.constant 0 : i32
    %c0_i32_1 = arith.constant 0 : i32
    return %c0_i32, %c0_i32_0 : i32, i32
  }
  func.func @transform_1(%arg0: i32) -> (i32, i32) {
    %c0_i32 = arith.constant 0 : i32
    %c0_i32_0 = arith.constant 0 : i32
    %c0_i32_1 = arith.constant 0 : i32
    return %c0_i32, %c0_i32_0 : i32, i32
  }
  func.func @transform_2(%arg0: i32) -> (i32, i32) {
    %c0_i32 = arith.constant 0 : i32
    %c0_i32_0 = arith.constant 0 : i32
    %c0_i32_1 = arith.constant 0 : i32
    return %c0_i32, %c0_i32_0 : i32, i32
  }
  func.func @transform_3(%arg0: i32) -> (i32, i32) {
    %c0_i32 = arith.constant 0 : i32
    %c0_i32_0 = arith.constant 0 : i32
    %c0_i32_1 = arith.constant 0 : i32
    return %c0_i32, %c0_i32_0 : i32, i32
  }
  func.func @transform_4(%arg0: i32) -> (i32, i32, i32) {
    %c0_i32 = arith.constant 0 : i32
    %c0_i32_0 = arith.constant 0 : i32
    %c0_i32_1 = arith.constant 0 : i32
    return %arg0, %c0_i32, %c0_i32_0 : i32, i32, i32
  }
  func.func @transform_5(%arg0: i32) -> (i32, i32) {
    %c0_i32 = arith.constant 0 : i32
    %c0_i32_0 = arith.constant 0 : i32
    %c0_i32_1 = arith.constant 0 : i32
    return %c0_i32, %c0_i32_0 : i32, i32
  }
}

</mosaic_0001>

<bundles_post_ra>
// kernel: tpu_custom_call.1
= control target key start
LH: loop header
LB: loop body
LE: loop exit
PB: predicated region body
PF: predicated region fallthrough
CT: control target
= control target key end

     0   :  { %10 = vsyncpa [#allocation5], 0  ;;  %s2197_s18 = smov 0   ;;  %s3827_s0 = inlined_call_operand.vmem [shape: s32[128,8], index: 0, kind: input, shape index: {}]   ;;  %s3828_s1 = inlined_call_operand.vmem [shape: f32[128,8], index: 1, kind: input, shape index: {}]   ;;  %s3829_s2 = inlined_call_operand.vmem [shape: f32[128,128], index: 2, kind: input, shape index: {}]   ;;  %s3830_s3 = inlined_call_operand.vmem [shape: f32[128,1], index: 3, kind: input, shape index: {}]   ;;  %s3831_s4 = inlined_call_operand.vmem [shape: f32[2,128,128], index: 4, kind: input, shape index: {}]   ;;  %s3832_s5 = inlined_call_operand.hbm [shape: f32[128,128], index: 5, kind: output, shape index: {}]  }
   0x1 LB: > { %s2203_s19 = sadd.s32 4294967295, %s2153_s18   ;;  %p1988_p0 = scmp.ge.s32.totalorder %s2153_s18, 1  ;;  %s2153_s18 = sphi %s2197_s18, %s16_s18  }
   0x2   : > { %p183_p1 = scmp.lt.s32.totalorder %s2153_s18, 3 }
   0x4   : > { %p184_p2 = pnand %p1988_p0, %p183_p1 }
   0x6   : > { %187 = sbr.rel (%p184_p2) target bundleno = 1406 (0x57e), region = 40 }
   0xb   : > { %p206_p3 = scmp.lt.s32.totalorder %s2203_s19, 1  ;;  %v2211_v0 = vld [vmem:[%s3830_s3] sm:$0xff]  ;;  %v2216_v1 = vld [vmem:[%s3830_s3 + $0x8] sm:$0xff]  ;;  %v2221_v2 = vld [vmem:[%s3830_s3 + $0x10] sm:$0xff]  ;;  %p1991_p4 = scmp.ne.s32.totalorder %s2203_s19, 0 }
   0xc   : > { %3856 = vst [vmem:[#allocation7_spill] sm:$0xff] %v2211_v0  ;;  %v2226_v3 = vld [vmem:[%s3830_s3 + $0x18] sm:$0xff]  ;;  %v2231_v4 = vld [vmem:[%s3830_s3 + $0x20] sm:$0xff]  ;;  %v2236_v5 = vld [vmem:[%s3830_s3 + $0x28] sm:$0xff] }
   0xd   : > { %3857 = vst [vmem:[#allocation8_spill] sm:$0xff] %v2216_v1  ;;  %s207_s7 = scalar_select %p206_p3, %s2203_s19, 1  ;;  %v2242_v6 = vld [vmem:[%s3830_s3 + $0x30] sm:$0xff]  ;;  %v2247_v7 = vld [vmem:[%s3830_s3 + $0x38] sm:$0xff]  ;;  %v2252_v8 = vld [vmem:[%s3830_s3 + $0x40] sm:$0xff] }
   0xe   : > { %3858 = vst [vmem:[#allocation9_spill] sm:$0xff] %v2221_v2  ;;  %v2257_v9 = vld [vmem:[%s3830_s3 + $0x48] sm:$0xff]  ;;  %v2262_v10 = vld [vmem:[%s3830_s3 + $0x50] sm:$0xff]  ;;  %v2267_v11 = vld [vmem:[%s3830_s3 + $0x58] sm:$0xff] }
   0xf   : > { %3859 = vst [vmem:[#allocation10_spill] sm:$0xff] %v2226_v3  ;;  %s1997_s22 = sshll.u32 %s207_s7, 7  ;;  %v2272_v12 = vld [vmem:[%s3830_s3 + $0x60] sm:$0xff]  ;;  %v2277_v13 = vld [vmem:[%s3830_s3 + $0x68] sm:$0xff]  ;;  %v2282_v14 = vld [vmem:[%s3830_s3 + $0x70] sm:$0xff] }
  0x10   : > { %3860 = vst [vmem:[#allocation11_spill] sm:$0xff] %v2231_v4  ;;  %s2287_s6 = scalar_lea.vmem %s3831_s4, %s1997_s22  ;;  %v2292_v15 = vld [vmem:[%s3830_s3 + $0x78] sm:$0xff] }
  0x11   : > { %3861 = vst [vmem:[#allocation12_spill] sm:$0xff] %v2236_v5 }
  0x12   : > { %3862 = vst [vmem:[#allocation13_spill] sm:$0xff] %v2242_v6 }
  0x13   : > { %3863 = vst [vmem:[#allocation14_spill] sm:$0xff] %v2247_v7 }
  0x14   : > { %3864 = vst [vmem:[#allocation15_spill] sm:$0xff] %v2252_v8 }
  0x15   : > { %3865 = vst [vmem:[#allocation16_spill] sm:$0xff] %v2257_v9 }
  0x16   : > { %3866 = vst [vmem:[#allocation17_spill] sm:$0xff] %v2262_v10 }
  0x17   : > { %3867 = vst [vmem:[#allocation18_spill] sm:$0xff] %v2267_v11  ;;  %230 = sbr.rel (%p1991_p4) target bundleno = 853 (0x355), region = 44 }
  0x18   : > { %3868 = vst [vmem:[#allocation19_spill] sm:$0xff] %v2272_v12 }
  0x19   : > { %3869 = vst [vmem:[#allocation20_spill] sm:$0xff] %v2277_v13 }
  0x1a   : > { %3870 = vst [vmem:[#allocation21_spill] sm:$0xff] %v2282_v14 }
  0x1b   : > { %3871 = vst [vmem:[#allocation22_spill] sm:$0xff] %v2292_v15 }
  0x1c   : > { %v2298_v16 = vld [vmem:[%s3827_s0 + $0x20] sm:$0xff]  ;;  %v2303_v17 = vld [vmem:[%s3827_s0 + $0x10] sm:$0xff]  ;;  %v2155_v19 = vmov 0   ;;  %v2316_v20 = vld [vmem:[%s3827_s0 + $0x28] sm:$0xff]  ;;  %v2156_v49 = vmov 1   ;;  %v2157_v12 = vmov 2  }
  0x1d   : > { %v2308_v18 = vld [vmem:[%s3827_s0] sm:$0xff]  ;;  %2058 = vset.pattern.permute.xlu2 %v2155_v19  ;;  %2057 = vset.pattern.permute.xlu1 %v2155_v19  ;;  %v2321_v21 = vld [vmem:[%s3827_s0 + $0x18] sm:$0xff]  ;;  %v2326_v22 = vld [vmem:[%s3827_s0 + $0x8] sm:$0xff] }
  0x1e   : > { %2056 = vset.pattern.permute.xlu0 %v2155_v19  ;;  %278 = vperm.xlu2 %2058, %v2298_v16   ;;  %v2334_v23 = vld [vmem:[%s3827_s0 + $0x40] sm:$0xff]  ;;  %v2339_v24 = vld [vmem:[%s3827_s0 + $0x38] sm:$0xff]  ;;  %v2344_v25 = vld [vmem:[%s3827_s0 + $0x30] sm:$0xff] }
  0x1f   : > { %272 = vperm.xlu1 %2057, %v2303_v17   ;;  %266 = vperm.xlu0 %2056, %v2308_v18   ;;  %v2352_v26 = vld [vmem:[%s3827_s0 + $0x58] sm:$0xff]  ;;  %v2357_v27 = vld [vmem:[%s3827_s0 + $0x50] sm:$0xff]  ;;  %v2362_v28 = vld [vmem:[%s3827_s0 + $0x48] sm:$0xff] }
  0x20   : > { %v2370_v29 = vld [vmem:[%s3827_s0 + $0x70] sm:$0xff]  ;;  %v2375_v30 = vld [vmem:[%s3827_s0 + $0x68] sm:$0xff]  ;;  %v2380_v31 = vld [vmem:[%s3827_s0 + $0x60] sm:$0xff] }
  0x21   : > { %v2388_v32 = vld [vmem:[%s3828_s1 + $0x8] sm:$0xff]  ;;  %v2393_v33 = vld [vmem:[%s3828_s1] sm:$0xff]  ;;  %v2398_v34 = vld [vmem:[%s3827_s0 + $0x78] sm:$0xff] }
  0x22   : > { %v2406_v35 = vld [vmem:[%s3828_s1 + $0x20] sm:$0xff]  ;;  %v2411_v36 = vld [vmem:[%s3828_s1 + $0x18] sm:$0xff]  ;;  %v2416_v37 = vld [vmem:[%s3828_s1 + $0x10] sm:$0xff] }
  0x23   : > { %3872 = vst [vmem:[#allocation23_spill] sm:$0xff] %v2406_v35  ;;  %v2424_v38 = vld [vmem:[%s3828_s1 + $0x38] sm:$0xff]  ;;  %v2429_v39 = vld [vmem:[%s3828_s1 + $0x30] sm:$0xff]  ;;  %v2434_v40 = vld [vmem:[%s3828_s1 + $0x28] sm:$0xff] }
  0x24   : > { %3873 = vst [vmem:[#allocation24_spill] sm:$0xff] %v2411_v36  ;;  %v2442_v41 = vld [vmem:[%s3828_s1 + $0x50] sm:$0xff]  ;;  %v2447_v42 = vld [vmem:[%s3828_s1 + $0x48] sm:$0xff]  ;;  %v2452_v43 = vld [vmem:[%s3828_s1 + $0x40] sm:$0xff] }
  0x25   : > { %3874 = vst [vmem:[#allocation25_spill] sm:$0xff] %v2424_v38  ;;  %v2460_v44 = vld [vmem:[%s3828_s1 + $0x68] sm:$0xff]  ;;  %v2465_v45 = vld [vmem:[%s3828_s1 + $0x60] sm:$0xff]  ;;  %v2470_v46 = vld [vmem:[%s3828_s1 + $0x58] sm:$0xff] }
  0x26   : > { %281 = vperm.xlu2 %2058, %v2316_v20   ;;  %3875 = vst [vmem:[#allocation26_spill] sm:$0xff] %v2429_v39  ;;  %v2478_v47 = vld [vmem:[%s3828_s1 + $0x78] sm:$0xff]  ;;  %v2483_v48 = vld [vmem:[%s3828_s1 + $0x70] sm:$0xff] }
  0x27   : > { %275 = vperm.xlu1 %2057, %v2321_v21   ;;  %269 = vperm.xlu0 %2056, %v2326_v22   ;;  %3876 = vst [vmem:[#allocation27_spill] sm:$0xff] %v2442_v41 }
  0x28   : > { %3877 = vst [vmem:[#allocation28_spill] sm:$0xff] %v2447_v42 }
  0x29   : > { %3878 = vst [vmem:[#allocation29_spill] sm:$0xff] %v2460_v44 }
  0x2a   : > { %3879 = vst [vmem:[#allocation30_spill] sm:$0xff] %v2465_v45 }
  0x2e   : > { %290 = vperm.xlu2 %2058, %v2334_v23  }
  0x2f   : > { %287 = vperm.xlu1 %2057, %v2339_v24   ;;  %284 = vperm.xlu0 %2056, %v2344_v25  }
  0x36   : > { %299 = vperm.xlu2 %2058, %v2352_v26  }
  0x37   : > { %296 = vperm.xlu1 %2057, %v2357_v27   ;;  %293 = vperm.xlu0 %2056, %v2362_v28  }
  0x3e   : > { %308 = vperm.xlu2 %2058, %v2370_v29  }
  0x3f   : > { %305 = vperm.xlu1 %2057, %v2375_v30   ;;  %302 = vperm.xlu0 %2056, %v2380_v31  }
  0x46   : > { %336 = vperm.xlu2 %2058, %v2388_v32  }
  0x47   : > { %331 = vperm.xlu1 %2057, %v2393_v33   ;;  %311 = vperm.xlu0 %2056, %v2398_v34  }
  0x4e   : > { %351 = vperm.xlu2 %2058, %v2406_v35  }
  0x4f   : > { %346 = vperm.xlu1 %2057, %v2411_v36   ;;  %341 = vperm.xlu0 %2056, %v2416_v37  }
  0x56   : > { %366 = vperm.xlu2 %2058, %v2424_v38  }
  0x57   : > { %361 = vperm.xlu1 %2057, %v2429_v39   ;;  %356 = vperm.xlu0 %2056, %v2434_v40  }
  0x5e   : > { %381 = vperm.xlu2 %2058, %v2442_v41  }
  0x5f   : > { %376 = vperm.xlu1 %2057, %v2447_v42   ;;  %371 = vperm.xlu0 %2056, %v2452_v43  }
  0x66   : > { %396 = vperm.xlu2 %2058, %v2460_v44  }
  0x67   : > { %391 = vperm.xlu1 %2057, %v2465_v45   ;;  %386 = vperm.xlu0 %2056, %v2470_v46  }
  0x6e   : > { %2059 = vset.pattern.permute.xlu2 %v2156_v49 }
  0x6f   : > { %406 = vperm.xlu1 %2057, %v2478_v47   ;;  %401 = vperm.xlu0 %2056, %v2483_v48  }
  0x70   : > { %426 = vperm.xlu2 %2059, %v2308_v18  }
  0x77   : > { %2061 = vset.pattern.permute.xlu1 %v2156_v49  ;;  %2060 = vset.pattern.permute.xlu0 %v2156_v49 }
  0x78   : > { %432 = vperm.xlu1 %2061, %v2303_v17   ;;  %435 = vperm.xlu2 %2059, %v2321_v21   ;;  %v2490_v50 = vpop.permute.xlu2 %278 }
  0x79   : > { %429 = vperm.xlu0 %2060, %v2326_v22  }
  0x80   : > { %438 = vperm.xlu1 %2061, %v2298_v16   ;;  %441 = vperm.xlu2 %2059, %v2316_v20   ;;  %v2495_v51 = vpop.permute.xlu2 %281 }
  0x81   : > { %444 = vperm.xlu0 %2060, %v2344_v25  }
  0x88   : > { %447 = vperm.xlu1 %2061, %v2339_v24   ;;  %450 = vperm.xlu2 %2059, %v2334_v23   ;;  %v2500_v52 = vpop.permute.xlu2 %290 }
  0x89   : > { %3880 = vst [vmem:[#allocation31_spill] sm:$0xff] %v2500_v52  ;;  %453 = vperm.xlu0 %2060, %v2362_v28  }
  0x90   : > { %456 = vperm.xlu1 %2061, %v2357_v27   ;;  %459 = vperm.xlu2 %2059, %v2352_v26   ;;  %v2505_v53 = vpop.permute.xlu2 %299 }
  0x91   : > { %3881 = vst [vmem:[#allocation32_spill] sm:$0xff] %v2505_v53  ;;  %462 = vperm.xlu0 %2060, %v2380_v31   ;;  %v2508_v54 = vpop.permute.xlu1 %272  ;;  %v2510_v55 = vpop.permute.xlu0 %266 }
  0x92   : > { %3882 = vst [vmem:[#allocation33_spill] sm:$0xff] %v2510_v55 }
  0x98   : > { %465 = vperm.xlu1 %2061, %v2375_v30   ;;  %468 = vperm.xlu2 %2059, %v2370_v29   ;;  %v2514_v56 = vpop.permute.xlu2 %308 }
  0x99   : > { %3883 = vst [vmem:[#allocation34_spill] sm:$0xff] %v2514_v56  ;;  %471 = vperm.xlu0 %2060, %v2398_v34   ;;  %v2517_v57 = vpop.permute.xlu1 %275  ;;  %v2519_v58 = vpop.permute.xlu0 %269 }
  0x9a   : > { %3884 = vst [vmem:[#allocation35_spill] sm:$0xff] %v2517_v57 }
  0xa0   : > { %490 = vperm.xlu1 %2061, %v2393_v33   ;;  %494 = vperm.xlu2 %2059, %v2388_v32   ;;  %v2523_v59 = vpop.permute.xlu2 %336 }
  0xa1   : > { %498 = vperm.xlu0 %2060, %v2416_v37   ;;  %v2526_v60 = vpop.permute.xlu1 %287  ;;  %v2528_v61 = vpop.permute.xlu0 %284 }
  0xa2   : > { %3885 = vst [vmem:[#allocation36_spill] sm:$0xff] %v2526_v60 }
  0xa3   : > { %3886 = vst [vmem:[#allocation37_spill] sm:$0xff] %v2528_v61 }
  0xa8   : > { %502 = vperm.xlu1 %2061, %v2411_v36   ;;  %506 = vperm.xlu2 %2059, %v2406_v35   ;;  %v2532_v62 = vpop.permute.xlu2 %351 }
  0xa9   : > { %3887 = vst [vmem:[#allocation38_spill] sm:$0xff] %v2532_v62  ;;  %510 = vperm.xlu0 %2060, %v2434_v40   ;;  %v2535_v63 = vpop.permute.xlu1 %296  ;;  %v2537_v19 = vpop.permute.xlu0 %293 }
  0xaa   : > { %3888 = vst [vmem:[#allocation39_spill] sm:$0xff] %v2535_v63 }
  0xab   : > { %3889 = vst [vmem:[#allocation40_spill] sm:$0xff] %v2537_v19 }
  0xb0   : > { %514 = vperm.xlu1 %2061, %v2429_v39   ;;  %518 = vperm.xlu2 %2059, %v2424_v38   ;;  %v2541_v49 = vpop.permute.xlu2 %366 }
  0xb1   : > { %3890 = vst [vmem:[#allocation41_spill] sm:$0xff] %v2541_v49  ;;  %522 = vperm.xlu0 %2060, %v2452_v43   ;;  %v2544_v7 = vpop.permute.xlu1 %305  ;;  %v2546_v6 = vpop.permute.xlu0 %302 }
  0xb2   : > { %3891 = vst [vmem:[#allocation42_spill] sm:$0xff] %v2544_v7 }
  0xb3   : > { %3892 = vst [vmem:[#allocation43_spill] sm:$0xff] %v2546_v6 }
  0xb8   : > { %526 = vperm.xlu1 %2061, %v2447_v42   ;;  %530 = vperm.xlu2 %2059, %v2442_v41   ;;  %v2550_v15 = vpop.permute.xlu2 %381 }
  0xb9   : > { %3893 = vst [vmem:[#allocation44_spill] sm:$0xff] %v2550_v15  ;;  %534 = vperm.xlu0 %2060, %v2470_v46   ;;  %v2553_v5 = vpop.permute.xlu1 %331  ;;  %v2555_v4 = vpop.permute.xlu0 %311 }
  0xba   : > { %3894 = vst [vmem:[#allocation45_spill] sm:$0xff] %v2553_v5 }
  0xbb   : > { %3895 = vst [vmem:[#allocation46_spill] sm:$0xff] %v2555_v4 }
  0xc0   : > { %538 = vperm.xlu1 %2061, %v2465_v45   ;;  %542 = vperm.xlu2 %2059, %v2460_v44   ;;  %v2559_v3 = vpop.permute.xlu2 %396 }
  0xc1   : > { %3896 = vst [vmem:[#allocation47_spill] sm:$0xff] %v2559_v3  ;;  %546 = vperm.xlu0 %2060, %v2483_v48   ;;  %v2562_v14 = vpop.permute.xlu1 %346  ;;  %v2564_v13 = vpop.permute.xlu0 %341 }
  0xc2   : > { %3897 = vst [vmem:[#allocation48_spill] sm:$0xff] %v2562_v14 }
  0xc8   : > { %550 = vperm.xlu1 %2061, %v2478_v47   ;;  %2062 = vset.pattern.permute.xlu2 %v2157_v12 }
  0xc9   : > { %2063 = vset.pattern.permute.xlu0 %v2157_v12  ;;  %v2567_v2 = vpop.permute.xlu1 %361  ;;  %586 = vperm.xlu2 %2062, %v2308_v18   ;;  %v2570_v1 = vpop.permute.xlu0 %356 }
  0xca   : > { %3898 = vst [vmem:[#allocation49_spill] sm:$0xff] %v2567_v2  ;;  %589 = vperm.xlu0 %2063, %v2326_v22   ;;  %v2573_v9 = vpop.permute.xlu2 %426 }
  0xcb   : > { %3899 = vst [vmem:[#allocation50_spill] sm:$0xff] %v2570_v1 }
  0xcc   : > { %3900 = vst [vmem:[#allocation51_spill] sm:$0xff] %v2573_v9 }
  0xd0   : > { %2064 = vset.pattern.permute.xlu1 %v2157_v12 }
  0xd1   : > { %592 = vperm.xlu1 %2064, %v2303_v17   ;;  %v2576_v0 = vpop.permute.xlu1 %376  ;;  %595 = vperm.xlu2 %2062, %v2321_v21   ;;  %v2579_v11 = vpop.permute.xlu0 %371 }
  0xd2   : > { %3901 = vst [vmem:[#allocation52_spill] sm:$0xff] %v2576_v0  ;;  %604 = vperm.xlu0 %2063, %v2344_v25   ;;  %v2582_v8 = vpop.permute.xlu2 %435 }
  0xd3   : > { %3902 = vst [vmem:[#allocation53_spill] sm:$0xff] %v2579_v11 }
  0xd4   : > { %3903 = vst [vmem:[#allocation54_spill] sm:$0xff] %v2582_v8 }
  0xd9   : > { %598 = vperm.xlu1 %2064, %v2298_v16   ;;  %v2585_v10 = vpop.permute.xlu1 %391  ;;  %601 = vperm.xlu2 %2062, %v2316_v20   ;;  %v2588_v5 = vpop.permute.xlu0 %386 }
  0xda   : > { %3904 = vst [vmem:[#allocation55_spill] sm:$0xff] %v2585_v10  ;;  %613 = vperm.xlu0 %2063, %v2362_v28   ;;  %v2591_v12 = vpop.permute.xlu2 %441 }
  0xdb   : > { %3905 = vst [vmem:[#allocation56_spill] sm:$0xff] %v2588_v5 }
  0xe1   : > { %607 = vperm.xlu1 %2064, %v2339_v24   ;;  %v2594_v9 = vpop.permute.xlu1 %406  ;;  %610 = vperm.xlu2 %2062, %v2334_v23   ;;  %v2597_v55 = vpop.permute.xlu0 %401 }
  0xe2   : > { %3906 = vst [vmem:[#allocation57_spill] sm:$0xff] %v2594_v9  ;;  %622 = vperm.xlu0 %2063, %v2380_v31   ;;  %v2600_v4 = vpop.permute.xlu2 %450 }
  0xe3   : > { %3907 = vst [vmem:[#allocation58_spill] sm:$0xff] %v2597_v55 }
  0xe4   : > { %3908 = vst [vmem:[#allocation59_spill] sm:$0xff] %v2600_v4 }
  0xe9   : > { %616 = vperm.xlu1 %2064, %v2357_v27   ;;  %619 = vperm.xlu2 %2062, %v2352_v26  }
  0xea   : > { %631 = vperm.xlu0 %2063, %v2398_v34   ;;  %v2605_v10 = vpop.permute.xlu1 %432  ;;  %v2607_v6 = vpop.permute.xlu2 %459 }
  0xeb   : > { %3909 = vst [vmem:[#allocation60_spill] sm:$0xff] %v2607_v6  ;;  %v2609_v0 = vpop.permute.xlu0 %429 }
  0xf1   : > { %625 = vperm.xlu1 %2064, %v2375_v30   ;;  %628 = vperm.xlu2 %2062, %v2370_v29  }
  0xf2   : > { %658 = vperm.xlu0 %2063, %v2416_v37   ;;  %v2614_v9 = vpop.permute.xlu1 %438  ;;  %v2616_v19 = vpop.permute.xlu2 %468 }
  0xf3   : > { %3910 = vst [vmem:[#allocation61_spill] sm:$0xff] %v2616_v19  ;;  %v2618_v2 = vpop.permute.xlu0 %444 }
  0xf4   : > { %3911 = vst [vmem:[#allocation62_spill] sm:$0xff] %v2618_v2 }
  0xf9   : > { %650 = vperm.xlu1 %2064, %v2393_v33   ;;  %654 = vperm.xlu2 %2062, %v2388_v32  }
  0xfa   : > { %670 = vperm.xlu0 %2063, %v2434_v40   ;;  %v2623_v61 = vpop.permute.xlu1 %447  ;;  %v2625_v55 = vpop.permute.xlu2 %494 }
  0xfb   : > { %3912 = vst [vmem:[#allocation63_spill] sm:$0xff] %v2623_v61  ;;  %v2627_v5 = vpop.permute.xlu0 %453 }
  0xfc   : > { %3913 = vst [vmem:[#allocation64_spill] sm:$0xff] %v2627_v5 }
 0x101   : > { %662 = vperm.xlu1 %2064, %v2411_v36   ;;  %666 = vperm.xlu2 %2062, %v2406_v35  }
 0x102   : > { %682 = vperm.xlu0 %2063, %v2452_v43   ;;  %v2632_v19 = vpop.permute.xlu1 %456  ;;  %v2634_v2 = vpop.permute.xlu2 %506 }
 0x103   : > { %3914 = vst [vmem:[#allocation65_spill] sm:$0xff] %v2632_v19  ;;  %v2636_v6 = vpop.permute.xlu0 %462 }
 0x104   : > { %3915 = vst [vmem:[#allocation66_spill] sm:$0xff] %v2636_v6 }
 0x109   : > { %674 = vperm.xlu1 %2064, %v2429_v39   ;;  %678 = vperm.xlu2 %2062, %v2424_v38  }
 0x10a   : > { %694 = vperm.xlu0 %2063, %v2470_v46   ;;  %v2641_v8 = vpop.permute.xlu1 %465  ;;  %v2643_v5 = vpop.permute.xlu2 %518 }
 0x10b   : > { %3916 = vst [vmem:[#allocation67_spill] sm:$0xff] %v2641_v8  ;;  %v2645_v14 = vpop.permute.xlu0 %471  ;;  %v2158_v8 = vmov 3  }
 0x10c   : > { %3917 = vst [vmem:[#allocation68_spill] sm:$0xff] %v2643_v5 }
 0x10d   : > { %3918 = vst [vmem:[#allocation69_spill] sm:$0xff] %v2645_v14 }
 0x111   : > { %686 = vperm.xlu1 %2064, %v2447_v42   ;;  %690 = vperm.xlu2 %2062, %v2442_v41  }
 0x112   : > { %706 = vperm.xlu0 %2063, %v2483_v48   ;;  %v2650_v19 = vpop.permute.xlu1 %490  ;;  %v2652_v6 = vpop.permute.xlu2 %530 }
 0x113   : > { %3919 = vst [vmem:[#allocation70_spill] sm:$0xff] %v2650_v19  ;;  %v2654_v3 = vpop.permute.xlu0 %498 }
 0x114   : > { %3920 = vst [vmem:[#allocation71_spill] sm:$0xff] %v2652_v6 }
 0x119   : > { %698 = vperm.xlu1 %2064, %v2465_v45   ;;  %702 = vperm.xlu2 %2062, %v2460_v44  }
 0x11a   : > { %2066 = vset.pattern.permute.xlu0 %v2158_v8  ;;  %v2658_v15 = vpop.permute.xlu1 %502  ;;  %v2660_v14 = vpop.permute.xlu2 %542 }
 0x11b   : > { %3921 = vst [vmem:[#allocation72_spill] sm:$0xff] %v2658_v15  ;;  %749 = vperm.xlu0 %2066, %v2326_v22   ;;  %v2663_v7 = vpop.permute.xlu0 %510 }
 0x11c   : > { %3922 = vst [vmem:[#allocation73_spill] sm:$0xff] %v2660_v14 }
 0x121   : > { %710 = vperm.xlu1 %2064, %v2478_v47   ;;  %2065 = vset.pattern.permute.xlu2 %v2158_v8 }
 0x122   : > { %v2666_v19 = vpop.permute.xlu1 %514  ;;  %746 = vperm.xlu2 %2065, %v2308_v18  }
 0x123   : > { %3923 = vst [vmem:[#allocation74_spill] sm:$0xff] %v2666_v19  ;;  %764 = vperm.xlu0 %2066, %v2344_v25   ;;  %v2670_v6 = vpop.permute.xlu0 %522  ;;  %v2672_v63 = vpop.permute.xlu2 %586 }
 0x124   : > { %3924 = vst [vmem:[#allocation75_spill] sm:$0xff] %v2670_v6 }
 0x125   : > { %3925 = vst [vmem:[#allocation76_spill] sm:$0xff] %v2672_v63 }
 0x129   : > { %2067 = vset.pattern.permute.xlu1 %v2158_v8 }
 0x12a   : > { %752 = vperm.xlu1 %2067, %v2303_v17   ;;  %v2675_v14 = vpop.permute.xlu1 %526  ;;  %755 = vperm.xlu2 %2065, %v2321_v21  }
 0x12b   : > { %3926 = vst [vmem:[#allocation77_spill] sm:$0xff] %v2675_v14  ;;  %773 = vperm.xlu0 %2066, %v2362_v28   ;;  %v2679_v15 = vpop.permute.xlu0 %534  ;;  %v2681_v19 = vpop.permute.xlu2 %595 }
 0x12c   : > { %3927 = vst [vmem:[#allocation78_spill] sm:$0xff] %v2679_v15 }
 0x12d   : > { %3928 = vst [vmem:[#allocation79_spill] sm:$0xff] %v2681_v19 }
 0x132   : > { %758 = vperm.xlu1 %2067, %v2298_v16   ;;  %v2684_v11 = vpop.permute.xlu1 %538  ;;  %761 = vperm.xlu2 %2065, %v2316_v20  }
 0x133   : > { %3929 = vst [vmem:[#allocation80_spill] sm:$0xff] %v2684_v11  ;;  %782 = vperm.xlu0 %2066, %v2380_v31   ;;  %v2688_v8 = vpop.permute.xlu0 %546  ;;  %v2690_v63 = vpop.permute.xlu2 %601 }
 0x134   : > { %3930 = vst [vmem:[#allocation81_spill] sm:$0xff] %v2688_v8 }
 0x135   : > { %3931 = vst [vmem:[#allocation82_spill] sm:$0xff] %v2690_v63 }
 0x13a   : > { %767 = vperm.xlu1 %2067, %v2339_v24   ;;  %v2693_v14 = vpop.permute.xlu1 %550  ;;  %770 = vperm.xlu2 %2065, %v2334_v23  }
 0x13b   : > { %3932 = vst [vmem:[#allocation83_spill] sm:$0xff] %v2693_v14  ;;  %791 = vperm.xlu0 %2066, %v2398_v34   ;;  %v2697_v19 = vpop.permute.xlu2 %610 }
 0x13c   : > { %3933 = vst [vmem:[#allocation84_spill] sm:$0xff] %v2697_v19  ;;  %v2699_v15 = vpop.permute.xlu0 %589 }
 0x142   : > { %776 = vperm.xlu1 %2067, %v2357_v27   ;;  %779 = vperm.xlu2 %2065, %v2352_v26  }
 0x143   : > { %818 = vperm.xlu0 %2066, %v2416_v37   ;;  %v2704_v11 = vpop.permute.xlu1 %592  ;;  %v2706_v8 = vpop.permute.xlu2 %619 }
 0x144   : > { %3934 = vst [vmem:[#allocation85_spill] sm:$0xff] %v2706_v8  ;;  %v2708_v56 = vpop.permute.xlu0 %604 }
 0x145   : > { %3935 = vst [vmem:[#allocation86_spill] sm:$0xff] %v2708_v56 }
 0x14a   : > { %785 = vperm.xlu1 %2067, %v2375_v30   ;;  %788 = vperm.xlu2 %2065, %v2370_v29  }
 0x14b   : > { %830 = vperm.xlu0 %2066, %v2434_v40   ;;  %v2713_v14 = vpop.permute.xlu1 %598  ;;  %v2715_v19 = vpop.permute.xlu2 %628 }
 0x14c   : > { %3936 = vst [vmem:[#allocation87_spill] sm:$0xff] %v2715_v19  ;;  %v2717_v49 = vpop.permute.xlu0 %613 }
 0x14d   : > { %3937 = vst [vmem:[#allocation88_spill] sm:$0xff] %v2717_v49 }
 0x152   : > { %810 = vperm.xlu1 %2067, %v2393_v33   ;;  %814 = vperm.xlu2 %2065, %v2388_v32  }
 0x153   : > { %842 = vperm.xlu0 %2066, %v2452_v43   ;;  %v2722_v8 = vpop.permute.xlu1 %607  ;;  %v2724_v56 = vpop.permute.xlu2 %654 }
 0x154   : > { %3938 = vst [vmem:[#allocation89_spill] sm:$0xff] %v2722_v8  ;;  %v2726_v6 = vpop.permute.xlu0 %622 }
 0x155   : > { %3939 = vst [vmem:[#allocation90_spill] sm:$0xff] %v2726_v6 }
 0x15a   : > { %822 = vperm.xlu1 %2067, %v2411_v36   ;;  %826 = vperm.xlu2 %2065, %v2406_v35  }
 0x15b   : > { %854 = vperm.xlu0 %2066, %v2470_v46   ;;  %v2731_v19 = vpop.permute.xlu1 %616  ;;  %v2733_v49 = vpop.permute.xlu2 %666 }
 0x15c   : > { %3940 = vst [vmem:[#allocation91_spill] sm:$0xff] %v2731_v19  ;;  %v2735_v53 = vpop.permute.xlu0 %631  ;;  %v2159_v19 = vmov 4  }
 0x15d   : > { %3941 = vst [vmem:[#allocation92_spill] sm:$0xff] %v2733_v49 }
 0x15e   : > { %3942 = vst [vmem:[#allocation93_spill] sm:$0xff] %v2735_v53 }
 0x162   : > { %834 = vperm.xlu1 %2067, %v2429_v39   ;;  %838 = vperm.xlu2 %2065, %v2424_v38  }
 0x163   : > { %866 = vperm.xlu0 %2066, %v2483_v48   ;;  %v2740_v8 = vpop.permute.xlu1 %625  ;;  %v2742_v6 = vpop.permute.xlu2 %678 }
 0x164   : > { %3943 = vst [vmem:[#allocation94_spill] sm:$0xff] %v2740_v8  ;;  %v2744_v5 = vpop.permute.xlu0 %658 }
 0x165   : > { %3944 = vst [vmem:[#allocation95_spill] sm:$0xff] %v2742_v6 }
 0x16a   : > { %846 = vperm.xlu1 %2067, %v2447_v42   ;;  %850 = vperm.xlu2 %2065, %v2442_v41  }
 0x16b   : > { %2069 = vset.pattern.permute.xlu0 %v2159_v19  ;;  %v2748_v61 = vpop.permute.xlu1 %650  ;;  %v2750_v53 = vpop.permute.xlu2 %690 }
 0x16c   : > { %3945 = vst [vmem:[#allocation96_spill] sm:$0xff] %v2748_v61  ;;  %909 = vperm.xlu0 %2069, %v2326_v22   ;;  %v2753_v4 = vpop.permute.xlu0 %670 }
 0x16d   : > { %3946 = vst [vmem:[#allocation97_spill] sm:$0xff] %v2750_v53 }
 0x16e   : > { %3947 = vst [vmem:[#allocation98_spill] sm:$0xff] %v2753_v4 }
 0x172   : > { %858 = vperm.xlu1 %2067, %v2465_v45   ;;  %862 = vperm.xlu2 %2065, %v2460_v44  }
 0x173   : > { %v2757_v8 = vpop.permute.xlu1 %662  ;;  %v2759_v6 = vpop.permute.xlu2 %702 }
 0x174   : > { %3948 = vst [vmem:[#allocation99_spill] sm:$0xff] %v2757_v8  ;;  %924 = vperm.xlu0 %2069, %v2344_v25   ;;  %v2762_v60 = vpop.permute.xlu0 %682 }
 0x175   : > { %3949 = vst [vmem:[#allocation100_spill] sm:$0xff] %v2759_v6 }
 0x176   : > { %3950 = vst [vmem:[#allocation101_spill] sm:$0xff] %v2762_v60 }
 0x17a   : > { %870 = vperm.xlu1 %2067, %v2478_v47   ;;  %2068 = vset.pattern.permute.xlu2 %v2159_v19 }
 0x17b   : > { %v2765_v61 = vpop.permute.xlu1 %674  ;;  %906 = vperm.xlu2 %2068, %v2308_v18  }
 0x17c   : > { %3951 = vst [vmem:[#allocation102_spill] sm:$0xff] %v2765_v61  ;;  %933 = vperm.xlu0 %2069, %v2362_v28   ;;  %v2769_v53 = vpop.permute.xlu0 %694  ;;  %v2771_v57 = vpop.permute.xlu2 %746 }
 0x17d   : > { %3952 = vst [vmem:[#allocation103_spill] sm:$0xff] %v2769_v53 }
 0x17e   : > { %3953 = vst [vmem:[#allocation104_spill] sm:$0xff] %v2771_v57 }
 0x182   : > { %2070 = vset.pattern.permute.xlu1 %v2159_v19 }
 0x183   : > { %912 = vperm.xlu1 %2070, %v2303_v17   ;;  %v2774_v6 = vpop.permute.xlu1 %686  ;;  %915 = vperm.xlu2 %2068, %v2321_v21  }
 0x184   : > { %3954 = vst [vmem:[#allocation105_spill] sm:$0xff] %v2774_v6  ;;  %942 = vperm.xlu0 %2069, %v2380_v31   ;;  %v2778_v8 = vpop.permute.xlu0 %706  ;;  %v2780_v61 = vpop.permute.xlu2 %755 }
 0x185   : > { %3955 = vst [vmem:[#allocation106_spill] sm:$0xff] %v2778_v8 }
 0x186   : > { %3956 = vst [vmem:[#allocation107_spill] sm:$0xff] %v2780_v61 }
 0x18b   : > { %918 = vperm.xlu1 %2070, %v2298_v16   ;;  %v2783_v60 = vpop.permute.xlu1 %698  ;;  %921 = vperm.xlu2 %2068, %v2316_v20  }
 0x18c   : > { %3957 = vst [vmem:[#allocation108_spill] sm:$0xff] %v2783_v60  ;;  %951 = vperm.xlu0 %2069, %v2398_v34   ;;  %v2787_v19 = vpop.permute.xlu2 %761 }
 0x18d   : > { %3958 = vst [vmem:[#allocation109_spill] sm:$0xff] %v2787_v19  ;;  %v2789_v57 = vpop.permute.xlu0 %749 }
 0x193   : > { %927 = vperm.xlu1 %2070, %v2339_v24   ;;  %v2792_v6 = vpop.permute.xlu1 %710  ;;  %930 = vperm.xlu2 %2068, %v2334_v23  }
 0x194   : > { %3959 = vst [vmem:[#allocation110_spill] sm:$0xff] %v2792_v6  ;;  %978 = vperm.xlu0 %2069, %v2416_v37   ;;  %v2796_v61 = vpop.permute.xlu2 %770 }
 0x195   : > { %3960 = vst [vmem:[#allocation111_spill] sm:$0xff] %v2796_v61  ;;  %v765_v8 = vpop.permute.xlu0 %764 }
 0x19b   : > { %936 = vperm.xlu1 %2070, %v2357_v27   ;;  %939 = vperm.xlu2 %2068, %v2352_v26  }
 0x19c   : > { %990 = vperm.xlu0 %2069, %v2434_v40   ;;  %v2801_v60 = vpop.permute.xlu1 %752  ;;  %v2803_v53 = vpop.permute.xlu2 %779 }
 0x19d   : > { %3961 = vst [vmem:[#allocation112_spill] sm:$0xff] %v2803_v53  ;;  %v774_v52 = vpop.permute.xlu0 %773 }
 0x1a3   : > { %945 = vperm.xlu1 %2070, %v2375_v30   ;;  %948 = vperm.xlu2 %2068, %v2370_v29  }
 0x1a4   : > { %1002 = vperm.xlu0 %2069, %v2452_v43   ;;  %v2808_v6 = vpop.permute.xlu1 %758  ;;  %v2810_v61 = vpop.permute.xlu2 %788 }
 0x1a5   : > { %3962 = vst [vmem:[#allocation113_spill] sm:$0xff] %v2808_v6  ;;  %v783_v19 = vpop.permute.xlu0 %782 }
 0x1a6   : > { %3963 = vst [vmem:[#allocation114_spill] sm:$0xff] %v2810_v61 }
 0x1ab   : > { %970 = vperm.xlu1 %2070, %v2393_v33   ;;  %974 = vperm.xlu2 %2068, %v2388_v32  }
 0x1ac   : > { %1014 = vperm.xlu0 %2069, %v2470_v46   ;;  %v2815_v4 = vpop.permute.xlu1 %767  ;;  %v2817_v53 = vpop.permute.xlu2 %814 }
 0x1ad   : > { %3964 = vst [vmem:[#allocation115_spill] sm:$0xff] %v2815_v4  ;;  %v792_v1 = vpop.permute.xlu0 %791  ;;  %v2160_v4 = vmov 5  }
 0x1b3   : > { %982 = vperm.xlu1 %2070, %v2411_v36   ;;  %986 = vperm.xlu2 %2068, %v2406_v35  }
 0x1b4   : > { %1026 = vperm.xlu0 %2069, %v2483_v48   ;;  %v2822_v6 = vpop.permute.xlu1 %776  ;;  %v2824_v61 = vpop.permute.xlu2 %826 }
 0x1b5   : > { %3965 = vst [vmem:[#allocation116_spill] sm:$0xff] %v2822_v6  ;;  %v2826_v49 = vpop.permute.xlu0 %818 }
 0x1bb   : > { %994 = vperm.xlu1 %2070, %v2429_v39   ;;  %998 = vperm.xlu2 %2068, %v2424_v38  }
 0x1bc   : > { %2072 = vset.pattern.permute.xlu0 %v2160_v4  ;;  %v2830_v63 = vpop.permute.xlu1 %785  ;;  %v2832_v62 = vpop.permute.xlu2 %838 }
 0x1bd   : > { %3966 = vst [vmem:[#allocation117_spill] sm:$0xff] %v2830_v63  ;;  %1069 = vperm.xlu0 %2072, %v2326_v22   ;;  %v2835_v35 = vpop.permute.xlu0 %830 }
 0x1c3   : > { %1006 = vperm.xlu1 %2070, %v2447_v42   ;;  %1010 = vperm.xlu2 %2068, %v2442_v41   ;;  %v263_v41 = vlaneseq }
 0x1c4   : > { %v2839_v6 = vpop.permute.xlu1 %810  ;;  %v2841_v36 = vpop.permute.xlu2 %850 }
 0x1c5   : > { %3967 = vst [vmem:[#allocation118_spill] sm:$0xff] %v2839_v6  ;;  %1084 = vperm.xlu0 %2072, %v2344_v25   ;;  %v2844_v38 = vpop.permute.xlu0 %842  ;;  %v2855_v6 = vand.u32 127, %v263_v41 }
 0x1c6   : > { %3968 = vst [vmem:[#allocation119_spill] sm:$0xff] %v2841_v36 }
 0x1c7   : > { %vm799_vm0 = vcmp.eq.s32.totalorder %v765_v8, %v2855_v6  ;;  %vm802_vm1 = vcmp.eq.s32.totalorder %v774_v52, %v2855_v6  ;;  %vm805_vm2 = vcmp.eq.s32.totalorder %v783_v19, %v2855_v6  ;;  %vm808_vm3 = vcmp.eq.s32.totalorder %v792_v1, %v2855_v6  ;;  %v3972_v19 = vld [vmem:[#allocation50_spill] sm:$0xff] }
 0x1c8   : > { %vm474_vm4 = vcmp.eq.s32.totalorder %v2609_v0, %v2855_v6  ;;  %vm314_vm5 = vcmp.eq.s32.totalorder %v2519_v58, %v2855_v6  ;;  %vm634_vm6 = vcmp.eq.s32.totalorder %v2699_v15, %v2855_v6  ;;  %vm475_vm7 = vcmp.eq.s32.totalorder %v2605_v10, %v2855_v6 }
 0x1c9   : > { %v554_v0 = vsel %vm474_vm4, %v2625_v55, 0.0  ;;  %vm794_vm8 = vcmp.eq.s32.totalorder %v2789_v57, %v2855_v6  ;;  %vm315_vm9 = vcmp.eq.s32.totalorder %v2508_v54, %v2855_v6  ;;  %v410_v15 = vsel %vm314_vm5, %v2523_v59, 0.0 }
 0x1ca   : > { %vm635_vm10 = vcmp.eq.s32.totalorder %v2704_v11, %v2855_v6  ;;  %v411_v10 = vsel %vm315_vm9, %v2564_v13, 0.0  ;;  %vm795_vm11 = vcmp.eq.s32.totalorder %v2801_v60, %v2855_v6  ;;  %vm317_vm13 = vcmp.eq.s32.totalorder %v2490_v50, %v2855_v6  ;;  %v3969_v60 = vld [vmem:[#allocation38_spill] sm:$0xff] }
 0x1cb   : > { %1018 = vperm.xlu1 %2070, %v2465_v45   ;;  %1022 = vperm.xlu2 %2068, %v2460_v44   ;;  %v875_v54 = vsel %vm795_vm11, %v2826_v49, 0.0  ;;  %vm318_vm14 = vcmp.eq.s32.totalorder %v2495_v51, %v2855_v6  ;;  %vm478_vm15 = vcmp.eq.s32.totalorder %v2591_v12, %v2855_v6  ;;  %v3971_v49 = vld [vmem:[#allocation92_spill] sm:$0xff]  ;;  %v3977_v51 = vld [vmem:[#allocation35_spill] sm:$0xff] }
 0x1cc   : > { %v2848_v63 = vpop.permute.xlu1 %822  ;;  %v2850_v39 = vpop.permute.xlu2 %862  ;;  %v558_v58 = vsel %vm478_vm15, %v2663_v7, 0.0  ;;  %v414_v7 = vsel %vm318_vm14, %v3972_v19, 0.0  ;;  %v3990_v19 = vld [vmem:[#allocation34_spill] sm:$0xff] }
 0x1cd   : > { %1093 = vperm.xlu0 %2072, %v2362_v28   ;;  %v2853_v42 = vpop.permute.xlu0 %854  ;;  %v574_v50 = vadd.f32 %v558_v58, %v414_v7  ;;  %v3986_v58 = vld [vmem:[#allocation89_spill] sm:$0xff] }
 0x1ce   : > { %vm640_vm14 = vcmp.eq.s32.totalorder %v3986_v58, %v2855_v6  ;;  %v3991_v7 = vld [vmem:[#allocation53_spill] sm:$0xff] }
 0x1d3   : > { %1030 = vperm.xlu1 %2070, %v2478_v47   ;;  %2071 = vset.pattern.permute.xlu2 %v2160_v4 }
 0x1d4   : > { %v835_v36 = vpop.permute.xlu1 %834  ;;  %1066 = vperm.xlu2 %2071, %v2308_v18  }
 0x1d5   : > { %v2860_v44 = vsel %vm799_vm0, %v835_v36, 0.0  ;;  %1102 = vperm.xlu0 %2072, %v2380_v31   ;;  %v2863_v45 = vpop.permute.xlu0 %866  ;;  %v2865_v28 = vpop.permute.xlu2 %906  ;;  %vm477_vm0 = vcmp.eq.s32.totalorder %v2614_v9, %v2855_v6 }
 0x1db   : > { %2073 = vset.pattern.permute.xlu1 %v2160_v4 }
 0x1dc   : > { %1072 = vperm.xlu1 %2073, %v2303_v17   ;;  %v847_v41 = vpop.permute.xlu1 %846  ;;  %1075 = vperm.xlu2 %2071, %v2321_v21  }
 0x1dd   : > { %v2870_v47 = vsel %vm802_vm1, %v847_v41, 0.0  ;;  %1111 = vperm.xlu0 %2072, %v2398_v34   ;;  %v2873_v18 = vpop.permute.xlu2 %915  ;;  %v3973_v41 = vld [vmem:[#allocation98_spill] sm:$0xff] }
 0x1de   : > { %v2875_v36 = vpop.permute.xlu0 %909 }
 0x1df   : > { %vm954_vm12 = vcmp.eq.s32.totalorder %v2875_v36, %v2855_v6 }
 0x1e4   : > { %1078 = vperm.xlu1 %2073, %v2298_v16   ;;  %v859_v4 = vpop.permute.xlu1 %858  ;;  %1081 = vperm.xlu2 %2071, %v2316_v20  }
 0x1e5   : > { %v2880_v31 = vsel %vm805_vm2, %v859_v4, 0.0  ;;  %1138 = vperm.xlu0 %2072, %v2416_v37   ;;  %v2883_v17 = vpop.permute.xlu2 %921  ;;  %vm637_vm2 = vcmp.eq.s32.totalorder %v2713_v14, %v2855_v6  ;;  %v3974_v4 = vld [vmem:[#allocation113_spill] sm:$0xff] }
 0x1e6   : > { %v2885_v21 = vpop.permute.xlu0 %924  ;;  %v717_v12 = vsel %vm637_vm2, %v3971_v49, 0.0  ;;  %vm797_vm4 = vcmp.eq.s32.totalorder %v3974_v4, %v2855_v6 }
 0x1ec   : > { %1087 = vperm.xlu1 %2073, %v2339_v24   ;;  %v871_v34 = vpop.permute.xlu1 %870  ;;  %1090 = vperm.xlu2 %2071, %v2334_v23  }
 0x1ed   : > { %v2890_v52 = vsel %vm808_vm3, %v871_v34, 0.0  ;;  %1150 = vperm.xlu0 %2072, %v2434_v40   ;;  %v2893_v16 = vpop.permute.xlu2 %930  ;;  %v570_v40 = vadd.f32 %v554_v0, %v410_v15  ;;  %v877_v34 = vsel %vm797_vm4, %v2824_v61, 0.0  ;;  %v3976_v0 = vld [vmem:[#allocation31_spill] sm:$0xff] }
 0x1ee   : > { %v2895_v20 = vpop.permute.xlu0 %933  ;;  %v3981_v61 = vld [vmem:[#allocation59_spill] sm:$0xff] }
 0x1ef   : > { %vm481_vm9 = vcmp.eq.s32.totalorder %v3981_v61, %v2855_v6  ;;  %v3998_v61 = vld [vmem:[#allocation47_spill] sm:$0xff] }
 0x1f4   : > { %1096 = vperm.xlu1 %2073, %v2357_v27   ;;  %1099 = vperm.xlu2 %2071, %v2352_v26  }
 0x1f5   : > { %1162 = vperm.xlu0 %2072, %v2452_v43   ;;  %v913_v1 = vpop.permute.xlu1 %912  ;;  %v2900_v37 = vpop.permute.xlu2 %939  ;;  %v715_v43 = vsel %vm635_vm10, %v2744_v5, 0.0 }
 0x1f6   : > { %v2902_v24 = vpop.permute.xlu0 %942  ;;  %vm955_vm1 = vcmp.eq.s32.totalorder %v913_v1, %v2855_v6  ;;  %v3975_v1 = vld [vmem:[#allocation109_spill] sm:$0xff] }
 0x1f7   : > { %vm798_vm5 = vcmp.eq.s32.totalorder %v3975_v1, %v2855_v6 }
 0x1f8   : > { %v878_v15 = vsel %vm798_vm5, %v2835_v35, 0.0  ;;  %v2161_v35 = vmov 6  }
 0x1fc   : > { %1105 = vperm.xlu1 %2073, %v2375_v30   ;;  %1108 = vperm.xlu2 %2071, %v2370_v29   ;;  %v555_v29 = vsel %vm475_vm7, %v2654_v3, 0.0  ;;  %v714_v30 = vsel %vm634_vm6, %v2724_v56, 0.0  ;;  %v874_v3 = vsel %vm794_vm8, %v2817_v53, 0.0  ;;  %v557_v56 = vsel %vm477_vm0, %v2634_v2, 0.0  ;;  %v3970_v2 = vld [vmem:[#allocation82_spill] sm:$0xff] }
 0x1fd   : > { %1174 = vperm.xlu0 %2072, %v2470_v46   ;;  %v2913_v23 = vpop.permute.xlu1 %918  ;;  %v2915_v26 = vpop.permute.xlu2 %948  ;;  %v571_v46 = vadd.f32 %v555_v29, %v411_v10  ;;  %v730_v55 = vadd.f32 %v714_v30, %v570_v40  ;;  %vm638_vm3 = vcmp.eq.s32.totalorder %v3970_v2, %v2855_v6  ;;  %vm321_vm6 = vcmp.eq.s32.totalorder %v3976_v0, %v2855_v6  ;;  %v3978_v30 = vld [vmem:[#allocation36_spill] sm:$0xff] }
 0x1fe   : > { %v2920_v27 = vpop.permute.xlu0 %951  ;;  %v718_v36 = vsel %vm638_vm3, %v3973_v41, 0.0  ;;  %vm316_vm7 = vcmp.eq.s32.totalorder %v3977_v51, %v2855_v6  ;;  %vm320_vm8 = vcmp.eq.s32.totalorder %v3978_v30, %v2855_v6  ;;  %v3979_v40 = vld [vmem:[#allocation24_spill] sm:$0xff]  ;;  %vm957_vm11 = vcmp.eq.s32.totalorder %v2913_v23, %v2855_v6  ;;  %v3985_v23 = vld [vmem:[#allocation75_spill] sm:$0xff]  ;;  %v3996_v30 = vld [vmem:[#allocation42_spill] sm:$0xff] }
 0x1ff   : > { %v731_v11 = vadd.f32 %v715_v43, %v571_v46  ;;  %v890_v5 = vadd.f32 %v874_v3, %v730_v55  ;;  %v734_v10 = vadd.f32 %v718_v36, %v574_v50  ;;  %v3980_v43 = vld [vmem:[#allocation23_spill] sm:$0xff]  ;;  %v3988_v2 = vld [vmem:[#allocation84_spill] sm:$0xff]  ;;  %vm327_vm0 = vcmp.eq.s32.totalorder %v3990_v19, %v2855_v6  ;;  %v3992_v36 = vld [vmem:[#allocation101_spill] sm:$0xff] }
 0x200   : > { %v3982_v46 = vld [vmem:[#allocation63_spill] sm:$0xff]  ;;  %vm641_vm15 = vcmp.eq.s32.totalorder %v3988_v2, %v2855_v6  ;;  %vm326_vm4 = vcmp.eq.s32.totalorder %v3996_v30, %v2855_v6  ;;  %v3997_v0 = vld [vmem:[#allocation44_spill] sm:$0xff]  ;;  %v4006_v2 = vld [vmem:[#allocation78_spill] sm:$0xff] }
 0x201   : > { %vm480_vm10 = vcmp.eq.s32.totalorder %v3982_v46, %v2855_v6  ;;  %v721_v4 = vsel %vm641_vm15, %v3992_v36, 0.0  ;;  %v3993_v50 = vld [vmem:[#allocation115_spill] sm:$0xff]  ;;  %v3035_v46 = vsel %vm326_vm4, %v3998_v61, 0.0  ;;  %v4009_v36 = vld [vmem:[#allocation85_spill] sm:$0xff]  ;;  %v4013_v30 = vld [vmem:[#allocation116_spill] sm:$0xff]  ;;  %vm964_vm4 = vcmp.eq.s32.totalorder %v2900_v37, %v2855_v6 }
 0x204   : > { %1130 = vperm.xlu1 %2073, %v2393_v33   ;;  %1134 = vperm.xlu2 %2071, %v2388_v32   ;;  %v891_v33 = vadd.f32 %v875_v54, %v731_v11  ;;  %v3983_v11 = vld [vmem:[#allocation68_spill] sm:$0xff] }
 0x205   : > { %1186 = vperm.xlu0 %2072, %v2483_v48   ;;  %v2950_v13 = vpop.permute.xlu1 %927  ;;  %v975_v53 = vpop.permute.xlu2 %974  ;;  %v413_v48 = vsel %vm317_vm13, %v3969_v60, 0.0 }
 0x206   : > { %v1034_v32 = vsel %vm954_vm12, %v975_v53, 0.0  ;;  %v979_v57 = vpop.permute.xlu0 %978  ;;  %v573_v14 = vadd.f32 %v557_v56, %v413_v48  ;;  %v894_v53 = vadd.f32 %v878_v15, %v734_v10  ;;  %vm958_vm12 = vcmp.eq.s32.totalorder %v2883_v17, %v2855_v6  ;;  %v3987_v48 = vld [vmem:[#allocation41_spill] sm:$0xff]  ;;  %v3995_v15 = vld [vmem:[#allocation111_spill] sm:$0xff] }
 0x207   : > { %v2957_v59 = vadd.f32 %v1034_v32, %v890_v5  ;;  %v1035_v9 = vsel %vm955_vm1, %v979_v57, 0.0  ;;  %v560_v5 = vsel %vm480_vm10, %v3983_v11, 0.0  ;;  %v3984_v32 = vld [vmem:[#allocation32_spill] sm:$0xff]  ;;  %v561_v57 = vsel %vm481_vm9, %v3985_v23, 0.0 }
 0x208   : > { %v2966_v8 = vadd.f32 %v1035_v9, %v891_v33  ;;  %v733_v29 = vadd.f32 %v717_v12, %v573_v14  ;;  %vm324_vm13 = vcmp.eq.s32.totalorder %v3984_v32, %v2855_v6  ;;  %v416_v17 = vsel %vm320_vm8, %v3987_v48, 0.0  ;;  %v4014_v32 = vld [vmem:[#allocation58_spill] sm:$0xff] }
 0x209   : > { %v417_v14 = vsel %vm321_vm6, %v3991_v7, 0.0  ;;  %v576_v41 = vadd.f32 %v560_v5, %v416_v17  ;;  %vm800_vm1 = vcmp.eq.s32.totalorder %v3993_v50, %v2855_v6  ;;  %vm801_vm3 = vcmp.eq.s32.totalorder %v3995_v15, %v2855_v6  ;;  %v4001_v5 = vld [vmem:[#allocation26_spill] sm:$0xff] }
 0x20a   : > { %v893_v3 = vadd.f32 %v877_v34, %v733_v29  ;;  %v3994_v34 = vld [vmem:[#allocation39_spill] sm:$0xff]  ;;  %v577_v1 = vadd.f32 %v561_v57, %v417_v14  ;;  %v880_v29 = vsel %vm800_vm1, %v2832_v62, 0.0  ;;  %v4000_v62 = vld [vmem:[#allocation54_spill] sm:$0xff]  ;;  %vm960_vm9 = vcmp.eq.s32.totalorder %v2950_v13, %v2855_v6  ;;  %v4008_v14 = vld [vmem:[#allocation56_spill] sm:$0xff] }
 0x20b   : > { %vm323_vm2 = vcmp.eq.s32.totalorder %v3994_v34, %v2855_v6  ;;  %vm476_vm5 = vcmp.eq.s32.totalorder %v4000_v62, %v2855_v6  ;;  %v4005_v57 = vld [vmem:[#allocation71_spill] sm:$0xff]  ;;  %v4011_v34 = vld [vmem:[#allocation72_spill] sm:$0xff] }
 0x20c   : > { %1142 = vperm.xlu1 %2073, %v3979_v40   ;;  %1146 = vperm.xlu2 %2071, %v3980_v43   ;;  %v419_v10 = vsel %vm323_vm2, %v3997_v0, 0.0  ;;  %v881_v43 = vsel %vm801_vm3, %v2844_v38, 0.0  ;;  %v737_v11 = vadd.f32 %v721_v4, %v577_v1  ;;  %v4004_v38 = vld [vmem:[#allocation65_spill] sm:$0xff]  ;;  %v556_v1 = vsel %vm476_vm5, %v4011_v34, 0.0  ;;  %v4018_v62 = vld [vmem:[#allocation67_spill] sm:$0xff] }
 0x20d   : > { %2075 = vset.pattern.permute.xlu0 %v2161_v35  ;;  %v2994_v55 = vpop.permute.xlu1 %936  ;;  %v987_v54 = vpop.permute.xlu2 %986  ;;  %vm483_vm8 = vcmp.eq.s32.totalorder %v4004_v38, %v2855_v6  ;;  %v423_v0 = vsel %vm327_vm0, %v4014_v32, 0.0  ;;  %vm486_vm15 = vcmp.eq.s32.totalorder %v4018_v62, %v2855_v6  ;;  %vm953_vm2 = vcmp.eq.s32.totalorder %v2865_v28, %v2855_v6  ;;  %v4031_v32 = vld [vmem:[#allocation117_spill] sm:$0xff] }
 0x20e   : > { %v1037_v56 = vsel %vm957_vm11, %v987_v54, 0.0  ;;  %1229 = vperm.xlu0 %2075, %v2326_v22   ;;  %v991_v33 = vpop.permute.xlu0 %990  ;;  %v3989_v22 = vld [vmem:[#allocation95_spill] sm:$0xff]  ;;  %v563_v58 = vsel %vm483_vm8, %v4005_v57, 0.0  ;;  %vm644_vm11 = vcmp.eq.s32.totalorder %v4009_v36, %v2855_v6  ;;  %vm963_vm3 = vcmp.eq.s32.totalorder %v2994_v55, %v2855_v6 }
 0x20f   : > { %v3005_v9 = vadd.f32 %v1037_v56, %v893_v3  ;;  %v1038_v60 = vsel %vm958_vm12, %v991_v33, 0.0  ;;  %v720_v49 = vsel %vm640_vm14, %v3989_v22, 0.0  ;;  %v3999_v3 = vld [vmem:[#allocation48_spill] sm:$0xff]  ;;  %v579_v50 = vadd.f32 %v563_v58, %v419_v10  ;;  %v4022_v57 = vld [vmem:[#allocation27_spill] sm:$0xff] }
 0x210   : > { %v3014_v12 = vadd.f32 %v1038_v60, %v894_v53  ;;  %v736_v40 = vadd.f32 %v720_v49, %v576_v41  ;;  %v412_v54 = vsel %vm316_vm7, %v3999_v3, 0.0  ;;  %v4002_v53 = vld [vmem:[#allocation25_spill] sm:$0xff]  ;;  %v4003_v56 = vld [vmem:[#allocation60_spill] sm:$0xff]  ;;  %v897_v60 = vadd.f32 %v881_v43, %v737_v11  ;;  %v4007_v49 = vld [vmem:[#allocation91_spill] sm:$0xff] }
 0x211   : > { %vm484_vm6 = vcmp.eq.s32.totalorder %v4003_v56, %v2855_v6  ;;  %vm961_vm7 = vcmp.eq.s32.totalorder %v2893_v16, %v2855_v6  ;;  %vm643_vm10 = vcmp.eq.s32.totalorder %v4007_v49, %v2855_v6  ;;  %v420_v41 = vsel %vm324_vm13, %v4008_v14, 0.0  ;;  %v4010_v16 = vld [vmem:[#allocation97_spill] sm:$0xff]  ;;  %v4015_v43 = vld [vmem:[#allocation119_spill] sm:$0xff]  ;;  %v4016_v10 = vld [vmem:[#allocation112_spill] sm:$0xff] }
 0x212   : > { %v896_v33 = vadd.f32 %v880_v29, %v736_v40  ;;  %v564_v22 = vsel %vm484_vm6, %v4006_v2, 0.0  ;;  %v723_v4 = vsel %vm643_vm10, %v4010_v16, 0.0  ;;  %v4012_v29 = vld [vmem:[#allocation103_spill] sm:$0xff]  ;;  %vm803_vm12 = vcmp.eq.s32.totalorder %v4013_v30, %v2855_v6  ;;  %v4017_v3 = vld [vmem:[#allocation61_spill] sm:$0xff] }
 0x213   : > { %v724_v15 = vsel %vm644_vm11, %v4012_v29, 0.0  ;;  %v580_v40 = vadd.f32 %v564_v22, %v420_v41  ;;  %v883_v61 = vsel %vm803_vm12, %v4015_v43, 0.0  ;;  %vm804_vm13 = vcmp.eq.s32.totalorder %v4016_v10, %v2855_v6  ;;  %v4020_v56 = vld [vmem:[#allocation73_spill] sm:$0xff]  ;;  %v4023_v58 = vld [vmem:[#allocation79_spill] sm:$0xff]  ;;  %v3108_v22 = vld [vmem:[%s3827_s0 + $0x48] sm:$0xff] }
 0x214   : > { %1154 = vperm.xlu1 %2073, %v4001_v5   ;;  %1158 = vperm.xlu2 %2071, %v4002_v53   ;;  %vm487_vm14 = vcmp.eq.s32.totalorder %v4017_v3, %v2855_v6  ;;  %v739_v11 = vadd.f32 %v723_v4, %v579_v50  ;;  %v884_v5 = vsel %vm804_vm13, %v2853_v42, 0.0  ;;  %v4019_v53 = vld [vmem:[#allocation62_spill] sm:$0xff]  ;;  %v572_v19 = vadd.f32 %v556_v1, %v412_v54  ;;  %v4024_v49 = vld [vmem:[#allocation81_spill] sm:$0xff]  ;;  %v4026_v41 = vld [vmem:[#allocation87_spill] sm:$0xff] }
 0x215   : > { %v3051_v51 = vpop.permute.xlu1 %945  ;;  %v999_v23 = vpop.permute.xlu2 %998  ;;  %vm479_vm1 = vcmp.eq.s32.totalorder %v4019_v53, %v2855_v6  ;;  %v566_v38 = vsel %vm486_vm15, %v4020_v56, 0.0  ;;  %vm636_vm0 = vcmp.eq.s32.totalorder %v4023_v58, %v2855_v6  ;;  %v567_v55 = vsel %vm487_vm14, %v4024_v49, 0.0  ;;  %v4027_v36 = vld [vmem:[#allocation99_spill] sm:$0xff]  ;;  %v4028_v4 = vld [vmem:[#allocation100_spill] sm:$0xff]  ;;  %v4029_v29 = vld [vmem:[#allocation106_spill] sm:$0xff] }
 0x216   : > { %v1040_v48 = vsel %vm960_vm9, %v999_v23, 0.0  ;;  %1244 = vperm.xlu0 %2075, %v2344_v25   ;;  %v1003_v17 = vpop.permute.xlu0 %1002  ;;  %v4021_v23 = vld [vmem:[#allocation28_spill] sm:$0xff]  ;;  %vm647_vm6 = vcmp.eq.s32.totalorder %v4026_v41, %v2855_v6  ;;  %v716_v16 = vsel %vm636_vm0, %v4027_v36, 0.0  ;;  %v582_v1 = vadd.f32 %v566_v38, %v3035_v46  ;;  %v4030_v30 = vld [vmem:[#allocation107_spill] sm:$0xff]  ;;  %v4032_v10 = vld [vmem:[#allocation114_spill] sm:$0xff] }
 0x217   : > { %v3060_v7 = vadd.f32 %v1040_v48, %v896_v33  ;;  %v1041_v13 = vsel %vm961_vm7, %v1003_v17, 0.0  ;;  %v740_v33 = vadd.f32 %v724_v15, %v580_v40  ;;  %v727_v15 = vsel %vm647_vm6, %v4029_v29, 0.0  ;;  %v4035_v38 = vld [vmem:[#allocation30_spill] sm:$0xff]  ;;  %v3156_v58 = vld [vmem:[%s3827_s0 + $0x60] sm:$0xff]  ;;  %v4040_v41 = vld [vmem:[#allocation64_spill] sm:$0xff] }
 0x218   : > { %v3069_v25 = vadd.f32 %v1041_v13, %v897_v60  ;;  %v899_v60 = vadd.f32 %v883_v61, %v739_v11  ;;  %v4025_v13 = vld [vmem:[#allocation94_spill] sm:$0xff]  ;;  %vm796_vm8 = vcmp.eq.s32.totalorder %v4030_v30, %v2855_v6  ;;  %vm806_vm9 = vcmp.eq.s32.totalorder %v4031_v32, %v2855_v6  ;;  %v4033_v11 = vld [vmem:[#allocation37_spill] sm:$0xff]  ;;  %v4043_v30 = vld [vmem:[#allocation88_spill] sm:$0xff] }
 0x219   : > { %v900_v54 = vadd.f32 %v884_v5, %v740_v33  ;;  %vm646_vm5 = vcmp.eq.s32.totalorder %v4025_v13, %v2855_v6  ;;  %v583_v40 = vadd.f32 %v567_v55, %v423_v0  ;;  %v876_v43 = vsel %vm796_vm8, %v2848_v63, 0.0  ;;  %v4034_v5 = vld [vmem:[#allocation74_spill] sm:$0xff]  ;;  %v4036_v63 = vld [vmem:[#allocation29_spill] sm:$0xff] }
 0x21a   : > { %v726_v50 = vsel %vm646_vm5, %v4028_v4, 0.0  ;;  %v886_v61 = vsel %vm806_vm9, %v2850_v39, 0.0  ;;  %vm807_vm7 = vcmp.eq.s32.totalorder %v4032_v10, %v2855_v6  ;;  %v732_v3 = vadd.f32 %v716_v16, %v572_v19  ;;  %v3187_v4 = vld [vmem:[%s3827_s0] sm:$0xff]  ;;  %v4045_v10 = vld [vmem:[#allocation105_spill] sm:$0xff] }
 0x21b   : > { %v742_v62 = vadd.f32 %v726_v50, %v582_v1  ;;  %v887_v46 = vsel %vm807_vm7, %v2863_v45, 0.0  ;;  %vm319_vm10 = vcmp.eq.s32.totalorder %v4033_v11, %v2855_v6  ;;  %v559_v56 = vsel %vm479_vm1, %v4034_v5, 0.0  ;;  %v4041_v50 = vld [vmem:[#allocation77_spill] sm:$0xff]  ;;  %v4046_v11 = vld [vmem:[#allocation66_spill] sm:$0xff] }
 0x21c   : > { %1166 = vperm.xlu1 %2073, %v4021_v23   ;;  %1170 = vperm.xlu2 %2071, %v4022_v57   ;;  %v743_v0 = vadd.f32 %v727_v15, %v583_v40  ;;  %v892_v39 = vadd.f32 %v876_v43, %v732_v3  ;;  %vm956_vm11 = vcmp.eq.s32.totalorder %v2873_v18, %v2855_v6  ;;  %v4037_v18 = vld [vmem:[#allocation86_spill] sm:$0xff]  ;;  %v4044_v43 = vld [vmem:[#allocation52_spill] sm:$0xff] }
 0x21d   : > { %v971_v42 = vpop.permute.xlu1 %970  ;;  %v1011_v48 = vpop.permute.xlu2 %1010  ;;  %v902_v33 = vadd.f32 %v886_v61, %v742_v62  ;;  %vm966_vm12 = vcmp.eq.s32.totalorder %v3051_v51, %v2855_v6  ;;  %vm967_vm13 = vcmp.eq.s32.totalorder %v2915_v26, %v2855_v6  ;;  %vm639_vm14 = vcmp.eq.s32.totalorder %v4037_v18, %v2855_v6  ;;  %v3194_v15 = vld [vmem:[%s3827_s0 + $0x78] sm:$0xff] }
 0x21e   : > { %v3103_v17 = vsel %vm953_vm2, %v971_v42, 0.0  ;;  %v1043_v2 = vsel %vm963_vm3, %v1011_v48, 0.0  ;;  %1253 = vperm.xlu0 %2075, %v3108_v22   ;;  %v1015_v28 = vpop.permute.xlu0 %1014  ;;  %v903_v23 = vadd.f32 %v887_v46, %v743_v0  ;;  %vm482_vm15 = vcmp.eq.s32.totalorder %v4040_v41, %v2855_v6  ;;  %v4053_v41 = vld [vmem:[#allocation83_spill] sm:$0xff] }
 0x21f   : > { %v3117_v37 = vadd.f32 %v1043_v2, %v899_v60  ;;  %v1044_v14 = vsel %vm964_vm4, %v1015_v28, 0.0  ;;  %v4039_v2 = vld [vmem:[#allocation102_spill] sm:$0xff]  ;;  %vm959_vm1 = vcmp.eq.s32.totalorder %v2885_v21, %v2855_v6  ;;  %v562_v1 = vsel %vm482_vm15, %v4041_v50, 0.0  ;;  %v4042_v21 = vld [vmem:[#allocation40_spill] sm:$0xff] }
 0x220   : > { %v3126_v34 = vadd.f32 %v1044_v14, %v900_v54  ;;  %v4038_v54 = vld [vmem:[#allocation49_spill] sm:$0xff]  ;;  %v719_v28 = vsel %vm639_vm14, %v4039_v2, 0.0  ;;  %v3175_v14 = vld [vmem:[%s3828_s1 + $0x78] sm:$0xff]  ;;  %vm322_vm0 = vcmp.eq.s32.totalorder %v4042_v21, %v2855_v6  ;;  %vm642_vm2 = vcmp.eq.s32.totalorder %v4043_v30, %v2855_v6 }
 0x221   : > { %v415_v26 = vsel %vm319_vm10, %v4038_v54, 0.0  ;;  %v418_v61 = vsel %vm322_vm0, %v4044_v43, 0.0  ;;  %v722_v3 = vsel %vm642_vm2, %v4045_v10, 0.0  ;;  %vm485_vm3 = vcmp.eq.s32.totalorder %v4046_v11, %v2855_v6  ;;  %v4054_v50 = vld [vmem:[#allocation46_spill] sm:$0xff]  ;;  %v4056_v30 = vld [vmem:[#allocation57_spill] sm:$0xff] }
 0x222   : > { %v575_v55 = vadd.f32 %v559_v56, %v415_v26  ;;  %v578_v62 = vadd.f32 %v562_v1, %v418_v61  ;;  %vm962_vm4 = vcmp.eq.s32.totalorder %v2895_v20, %v2855_v6  ;;  %v3218_v56 = vld [vmem:[%s3827_s0 + $0x10] sm:$0xff]  ;;  %vm965_vm9 = vcmp.eq.s32.totalorder %v2902_v24, %v2855_v6  ;;  %v3267_v24 = vld [vmem:[%s3828_s1 + $0x28] sm:$0xff]  ;;  %v4057_v61 = vld [vmem:[#allocation110_spill] sm:$0xff] }
 0x223   : > { %v3231_v20 = vld [vmem:[%s3828_s1 + $0x10] sm:$0xff]  ;;  %vm328_vm7 = vcmp.eq.s32.totalorder %v4054_v50, %v2855_v6  ;;  %v3286_v11 = vld [vmem:[%s3827_s0 + $0x38] sm:$0xff]  ;;  %v3356_v50 = vld [vmem:[%s3828_s1] sm:$0xff] }
 0x224   : > { %1178 = vperm.xlu1 %2073, %v4035_v38   ;;  %1182 = vperm.xlu2 %2071, %v4036_v63   ;;  %v735_v13 = vadd.f32 %v719_v28, %v575_v55  ;;  %v738_v46 = vadd.f32 %v722_v3, %v578_v62  ;;  %v4047_v38 = vld [vmem:[#allocation80_spill] sm:$0xff]  ;;  %v4052_v26 = vld [vmem:[#allocation69_spill] sm:$0xff]  ;;  %v3254_v28 = vld [vmem:[%s3827_s0 + $0x20] sm:$0xff]  ;;  %v424_v43 = vsel %vm328_vm7, %v4056_v30, 0.0  ;;  %v3851_v30 = vmov 7  }
 0x225   : > { %v983_v45 = vpop.permute.xlu1 %982  ;;  %v1023_v19 = vpop.permute.xlu2 %1022  ;;  %vm488_vm8 = vcmp.eq.s32.totalorder %v4052_v26, %v2855_v6  ;;  %v4055_v1 = vld [vmem:[#allocation93_spill] sm:$0xff] }
 0x226   : > { %v1036_v53 = vsel %vm956_vm11, %v983_v45, 0.0  ;;  %v1046_v57 = vsel %vm966_vm12, %v1023_v19, 0.0  ;;  %1262 = vperm.xlu0 %2075, %v3156_v58   ;;  %v1027_v60 = vpop.permute.xlu0 %1026  ;;  %v895_v36 = vadd.f32 %v2860_v44, %v735_v13  ;;  %v898_v5 = vadd.f32 %v2870_v47, %v738_v46  ;;  %v4049_v45 = vld [vmem:[#allocation90_spill] sm:$0xff]  ;;  %v3260_v13 = vld [vmem:[%s3827_s0 + $0x28] sm:$0xff]  ;;  %v3342_v26 = vld [vmem:[%s3828_s1 + $0x70] sm:$0xff] }
 0x227   : > { %v3161_v51 = vadd.f32 %v1036_v53, %v892_v39  ;;  %v3163_v42 = vadd.f32 %v1046_v57, %v902_v33  ;;  %v1047_v48 = vsel %vm967_vm13, %v1027_v60, 0.0  ;;  %v565_v47 = vsel %vm485_vm3, %v4047_v38, 0.0  ;;  %v4048_v33 = vld [vmem:[#allocation43_spill] sm:$0xff]  ;;  %v4051_v60 = vld [vmem:[#allocation108_spill] sm:$0xff] }
 0x228   : > { %v3170_v49 = vadd.f32 %v1047_v48, %v903_v23  ;;  %vm325_vm5 = vcmp.eq.s32.totalorder %v4048_v33, %v2855_v6  ;;  %vm645_vm6 = vcmp.eq.s32.totalorder %v4049_v45, %v2855_v6  ;;  %v4050_v53 = vld [vmem:[#allocation55_spill] sm:$0xff]  ;;  %vm648_vm10 = vcmp.eq.s32.totalorder %v4055_v1, %v2855_v6  ;;  %v3308_v33 = vld [vmem:[%s3827_s0 + $0x50] sm:$0xff]  ;;  %v3314_v45 = vld [vmem:[%s3827_s0 + $0x58] sm:$0xff] }
 0x229   : > { %v421_v57 = vsel %vm325_vm5, %v4050_v53, 0.0  ;;  %v725_v18 = vsel %vm645_vm6, %v4051_v60, 0.0  ;;  %v728_v10 = vsel %vm648_vm10, %v4057_v61, 0.0  ;;  %vm968_vm11 = vcmp.eq.s32.totalorder %v2920_v27, %v2855_v6  ;;  %v3320_v53 = vld [vmem:[%s3828_s1 + $0x58] sm:$0xff]  ;;  %v3362_v1 = vld [vmem:[%s3828_s1 + $0x8] sm:$0xff] }
 0x22a   : > { %v581_v48 = vadd.f32 %v565_v47, %v421_v57  ;;  %v2102_v61 = vld [vmem:[%s3827_s0 + $0x8] sm:$0xff] }
 0x22c   : > { %1190 = vperm.xlu1 %2073, %v3175_v14   ;;  %2074 = vset.pattern.permute.xlu2 %v2161_v35  ;;  %v741_v54 = vadd.f32 %v725_v18, %v581_v48  ;;  %v3330_v48 = vld [vmem:[%s3827_s0 + $0x68] sm:$0xff] }
 0x22d   : > { %v995_v16 = vpop.permute.xlu1 %994  ;;  %1226 = vperm.xlu2 %2074, %v3187_v4  }
 0x22e   : > { %v1039_v29 = vsel %vm959_vm1, %v995_v16, 0.0  ;;  %1271 = vperm.xlu0 %2075, %v3194_v15   ;;  %v3197_v44 = vpop.permute.xlu2 %1066  ;;  %v901_v2 = vadd.f32 %v2880_v31, %v741_v54  ;;  %v568_v31 = vsel %vm488_vm8, %v4053_v41, 0.0  ;;  %v3336_v54 = vld [vmem:[%s3827_s0 + $0x70] sm:$0xff] }
 0x22f   : > { %v3203_v32 = vadd.f32 %v1039_v29, %v895_v36  ;;  %v3205_v40 = vpop.permute.xlu0 %1069  ;;  %v584_v3 = vadd.f32 %v568_v31, %v424_v43  ;;  %vm1113_vm8 = vcmp.eq.s32.totalorder %v3197_v44, %v2855_v6 }
 0x230   : > { %vm1114_vm13 = vcmp.eq.s32.totalorder %v3205_v40, %v2855_v6 }
 0x231   : > { %v744_v62 = vadd.f32 %v728_v10, %v584_v3 }
 0x233   : > { %v904_v46 = vadd.f32 %v2890_v52, %v744_v62  ;;  %v3298_v52 = vld [vmem:[%s3828_s1 + $0x40] sm:$0xff] }
 0x234   : > { %2076 = vset.pattern.permute.xlu1 %v2161_v35  ;;  %v3224_v35 = vld [vmem:[%s3827_s0 + $0x18] sm:$0xff] }
 0x235   : > { %1232 = vperm.xlu1 %2076, %v3218_v56   ;;  %v1007_v0 = vpop.permute.xlu1 %1006  ;;  %1235 = vperm.xlu2 %2074, %v3224_v35  }
 0x236   : > { %v1042_v63 = vsel %vm962_vm4, %v1007_v0, 0.0  ;;  %1298 = vperm.xlu0 %2075, %v3231_v20   ;;  %v3234_v39 = vpop.permute.xlu2 %1075  ;;  %v3292_v0 = vld [vmem:[%s3827_s0 + $0x40] sm:$0xff] }
 0x237   : > { %v3240_v19 = vadd.f32 %v1042_v63, %v898_v5  ;;  %v3242_v23 = vpop.permute.xlu0 %1084  ;;  %vm1116_vm10 = vcmp.eq.s32.totalorder %v3234_v39, %v2855_v6 }
 0x23d   : > { %1238 = vperm.xlu1 %2076, %v3254_v28   ;;  %v1019_v55 = vpop.permute.xlu1 %1018  ;;  %1241 = vperm.xlu2 %2074, %v3260_v13  }
 0x23e   : > { %v1045_v36 = vsel %vm965_vm9, %v1019_v55, 0.0  ;;  %1310 = vperm.xlu0 %2075, %v3267_v24   ;;  %v1082_v16 = vpop.permute.xlu2 %1081 }
 0x23f   : > { %v3274_v29 = vadd.f32 %v1045_v36, %v901_v2  ;;  %v3276_v21 = vpop.permute.xlu0 %1093  ;;  %vm1118_vm14 = vcmp.eq.s32.totalorder %v1082_v16, %v2855_v6  ;;  %v3385_v16 = vld [vmem:[%s3828_s1 + $0x20] sm:$0xff] }
 0x240   : > { %4058 = vst [vmem:[#allocation38_spill] sm:$0xff] %v3385_v16 }
 0x245   : > { %1247 = vperm.xlu1 %2076, %v3286_v11   ;;  %v1031_v5 = vpop.permute.xlu1 %1030  ;;  %1250 = vperm.xlu2 %2074, %v3292_v0  }
 0x246   : > { %v1048_v38 = vsel %vm968_vm11, %v1031_v5, 0.0  ;;  %1322 = vperm.xlu0 %2075, %v3298_v52   ;;  %v1091_v27 = vpop.permute.xlu2 %1090  ;;  %v3379_v5 = vld [vmem:[%s3828_s1 + $0x18] sm:$0xff] }
 0x247   : > { %v3301_v47 = vadd.f32 %v1048_v38, %v904_v46  ;;  %v3303_v63 = vpop.permute.xlu0 %1102  ;;  %vm1121_vm1 = vcmp.eq.s32.totalorder %v1091_v27, %v2855_v6  ;;  %v4062_v27 = vld [vmem:[#allocation70_spill] sm:$0xff] }
 0x24d   : > { %1256 = vperm.xlu1 %2076, %v3308_v33   ;;  %1259 = vperm.xlu2 %2074, %v3314_v45  }
 0x24e   : > { %1334 = vperm.xlu0 %2075, %v3320_v53   ;;  %v1073_v57 = vpop.permute.xlu1 %1072  ;;  %v3323_v60 = vpop.permute.xlu2 %1099 }
 0x24f   : > { %v3325_v18 = vpop.permute.xlu0 %1111  ;;  %vm1115_vm12 = vcmp.eq.s32.totalorder %v1073_v57, %v2855_v6  ;;  %v2105_v57 = vld [vmem:[%s3827_s0 + $0x30] sm:$0xff]  ;;  %vm1124_vm5 = vcmp.eq.s32.totalorder %v3323_v60, %v2855_v6 }
 0x255   : > { %1265 = vperm.xlu1 %2076, %v3330_v48   ;;  %1268 = vperm.xlu2 %2074, %v3336_v54  }
 0x256   : > { %1346 = vperm.xlu0 %2075, %v3342_v26   ;;  %v1079_v2 = vpop.permute.xlu1 %1078  ;;  %v3345_v55 = vpop.permute.xlu2 %1108 }
 0x257   : > { %v1139_v41 = vpop.permute.xlu0 %1138  ;;  %vm1117_vm15 = vcmp.eq.s32.totalorder %v1079_v2, %v2855_v6  ;;  %v4060_v2 = vld [vmem:[#allocation33_spill] sm:$0xff]  ;;  %vm1127_vm7 = vcmp.eq.s32.totalorder %v3345_v55, %v2855_v6 }
 0x258   : > { %v1195_v31 = vsel %vm1115_vm12, %v1139_v41, 0.0  ;;  %vm313_vm0 = vcmp.eq.s32.totalorder %v4060_v2, %v2855_v6  ;;  %vm1119_vm12 = vcmp.eq.s32.totalorder %v3242_v23, %v2855_v6 }
 0x259   : > { %v3349_v36 = vadd.f32 %v1195_v31, %v2966_v8 }
 0x25d   : > { %1290 = vperm.xlu1 %2076, %v3356_v50   ;;  %1294 = vperm.xlu2 %2074, %v3362_v1  }
 0x25e   : > { %2078 = vset.pattern.permute.xlu0 %v3851_v30  ;;  %v1088_v8 = vpop.permute.xlu1 %1087  ;;  %v1135_v43 = vpop.permute.xlu2 %1134 }
 0x25f   : > { %v1194_v40 = vsel %vm1114_vm13, %v1135_v43, 0.0  ;;  %1389 = vperm.xlu0 %2078, %v2102_v61   ;;  %v1151_v10 = vpop.permute.xlu0 %1150  ;;  %v4061_v61 = vld [vmem:[#allocation51_spill] sm:$0xff]  ;;  %vm1120_vm4 = vcmp.eq.s32.totalorder %v1088_v8, %v2855_v6  ;;  %vm1122_vm13 = vcmp.eq.s32.totalorder %v3276_v21, %v2855_v6 }
 0x260   : > { %v3371_v3 = vadd.f32 %v1194_v40, %v2957_v59  ;;  %v1198_v62 = vsel %vm1118_vm14, %v1151_v10, 0.0  ;;  %vm473_vm2 = vcmp.eq.s32.totalorder %v4061_v61, %v2855_v6  ;;  %vm1125_vm14 = vcmp.eq.s32.totalorder %v3303_v63, %v2855_v6 }
 0x261   : > { %v3374_v46 = vadd.f32 %v1198_v62, %v3014_v12  ;;  %v553_v10 = vsel %vm473_vm2, %v4062_v27, 0.0  ;;  %v3407_v62 = vld [vmem:[%s3828_s1 + $0x30] sm:$0xff] }
 0x262   : > { %4063 = vst [vmem:[#allocation92_spill] sm:$0xff] %v3407_v62 }
 0x265   : > { %1302 = vperm.xlu1 %2076, %v3379_v5   ;;  %1306 = vperm.xlu2 %2074, %v3385_v16  }
 0x266   : > { %v1097_v59 = vpop.permute.xlu1 %1096  ;;  %v1147_v38 = vpop.permute.xlu2 %1146 }
 0x267   : > { %v1197_v12 = vsel %vm1117_vm15, %v1147_v38, 0.0  ;;  %1404 = vperm.xlu0 %2078, %v2105_v57   ;;  %v1163_v41 = vpop.permute.xlu0 %1162  ;;  %v4066_v57 = vld [vmem:[#allocation45_spill] sm:$0xff]  ;;  %vm1123_vm9 = vcmp.eq.s32.totalorder %v1097_v59, %v2855_v6  ;;  %vm1128_vm15 = vcmp.eq.s32.totalorder %v3325_v18, %v2855_v6 }
 0x268   : > { %v3394_v31 = vadd.f32 %v1197_v12, %v3005_v9  ;;  %v1201_v43 = vsel %vm1121_vm1, %v1163_v41, 0.0  ;;  %v3413_v9 = vld [vmem:[%s3828_s1 + $0x38] sm:$0xff]  ;;  %v409_v41 = vsel %vm313_vm0, %v4066_v57, 0.0 }
 0x269   : > { %v3397_v40 = vadd.f32 %v1201_v43, %v3069_v25  ;;  %4064 = vst [vmem:[#allocation50_spill] sm:$0xff] %v3413_v9  ;;  %v4065_v25 = vld [vmem:[#allocation76_spill] sm:$0xff]  ;;  %v569_v30 = vadd.f32 %v553_v10, %v409_v41 }
 0x26a   : > { %4059 = vst [vmem:[#allocation82_spill] sm:$0xff] %v3394_v31  ;;  %vm633_vm3 = vcmp.eq.s32.totalorder %v4065_v25, %v2855_v6  ;;  %v4067_v43 = vld [vmem:[#allocation96_spill] sm:$0xff] }
 0x26b   : > { %v713_v2 = vsel %vm633_vm3, %v4067_v43, 0.0 }
 0x26c   : > { %v729_v43 = vadd.f32 %v713_v2, %v569_v30 }
 0x26d   : > { %1314 = vperm.xlu1 %2076, %v3407_v62   ;;  %1318 = vperm.xlu2 %2074, %v3413_v9   ;;  %v4068_v9 = vld [vmem:[#allocation104_spill] sm:$0xff]  ;;  %v4069_v62 = vld [vmem:[#allocation118_spill] sm:$0xff] }
 0x26e   : > { %v1106_v38 = vpop.permute.xlu1 %1105  ;;  %v1159_v12 = vpop.permute.xlu2 %1158  ;;  %vm793_vm6 = vcmp.eq.s32.totalorder %v4068_v9, %v2855_v6 }
 0x26f   : > { %v1200_v61 = vsel %vm1120_vm4, %v1159_v12, 0.0  ;;  %1413 = vperm.xlu0 %2078, %v3108_v22   ;;  %v1175_v27 = vpop.permute.xlu0 %1174  ;;  %v873_v31 = vsel %vm793_vm6, %v4069_v62, 0.0  ;;  %v3436_v22 = vld [vmem:[%s3828_s1 + $0x48] sm:$0xff]  ;;  %vm1126_vm11 = vcmp.eq.s32.totalorder %v1106_v38, %v2855_v6 }
 0x270   : > { %v3427_v25 = vadd.f32 %v1200_v61, %v3060_v7  ;;  %v1204_v8 = vsel %vm1124_vm5, %v1175_v27, 0.0  ;;  %v889_v16 = vadd.f32 %v873_v31, %v729_v43  ;;  %v3442_v7 = vld [vmem:[%s3828_s1 + $0x50] sm:$0xff]  ;;  %v4070_v27 = vmov 7  }
 0x271   : > { %v3431_v57 = vadd.f32 %v1204_v8, %v3126_v34 }
 0x272   : > { %v1049_v60 = vadd.f32 %v3103_v17, %v889_v16  ;;  %v3463_v16 = vld [vmem:[%s3828_s1 + $0x60] sm:$0xff] }
 0x275   : > { %1326 = vperm.xlu1 %2076, %v3436_v22   ;;  %1330 = vperm.xlu2 %2074, %v3442_v7  }
 0x276   : > { %v1131_v34 = vpop.permute.xlu1 %1130  ;;  %v1171_v30 = vpop.permute.xlu2 %1170 }
 0x277   : > { %v1193_v31 = vsel %vm1113_vm8, %v1131_v34, 0.0  ;;  %v1203_v10 = vsel %vm1123_vm9, %v1171_v30, 0.0  ;;  %1422 = vperm.xlu0 %2078, %v3156_v58   ;;  %v1187_v62 = vpop.permute.xlu0 %1186  ;;  %v3469_v58 = vld [vmem:[%s3828_s1 + $0x68] sm:$0xff] }
 0x278   : > { %v3452_v9 = vadd.f32 %v1193_v31, %v1049_v60  ;;  %v3455_v12 = vadd.f32 %v1203_v10, %v3117_v37  ;;  %v1207_v17 = vsel %vm1127_vm7, %v1187_v62, 0.0  ;;  %v4071_v10 = vld [vmem:[#allocation38_spill] sm:$0xff] }
 0x279   : > { %v3458_v44 = vadd.f32 %v1207_v17, %v3170_v49 }
 0x27d   : > { %1338 = vperm.xlu1 %2076, %v3463_v16   ;;  %1342 = vperm.xlu2 %2074, %v3469_v58  }
 0x27e   : > { %v1143_v37 = vpop.permute.xlu1 %1142  ;;  %v1183_v49 = vpop.permute.xlu2 %1182 }
 0x27f   : > { %v1196_v55 = vsel %vm1116_vm10, %v1143_v37, 0.0  ;;  %v1206_v59 = vsel %vm1126_vm11, %v1183_v49, 0.0  ;;  %1431 = vperm.xlu0 %2078, %v3194_v15   ;;  %v4072_v37 = vld [vmem:[#allocation82_spill] sm:$0xff] }
 0x280   : > { %v3477_v41 = vadd.f32 %v1196_v55, %v3161_v51  ;;  %v3480_v2 = vadd.f32 %v1206_v59, %v3163_v42  ;;  %v3482_v61 = vpop.permute.xlu0 %1229 }
 0x281   : > { %vm1274_vm2 = vcmp.eq.s32.totalorder %v3482_v61, %v2855_v6 }
 0x285   : > { %1350 = vperm.xlu1 %2076, %v3175_v14   ;;  %2077 = vset.pattern.permute.xlu2 %v4070_v27 }
 0x286   : > { %v1155_v39 = vpop.permute.xlu1 %1154  ;;  %1386 = vperm.xlu2 %2077, %v3187_v4  }
 0x287   : > { %v1199_v38 = vsel %vm1119_vm12, %v1155_v39, 0.0  ;;  %1458 = vperm.xlu0 %2078, %v3231_v20   ;;  %v3490_v51 = vpop.permute.xlu2 %1226 }
 0x288   : > { %v3493_v42 = vadd.f32 %v1199_v38, %v3203_v32  ;;  %v3495_v15 = vpop.permute.xlu0 %1244  ;;  %vm1273_vm9 = vcmp.eq.s32.totalorder %v3490_v51, %v2855_v6 }
 0x289   : > { %vm1279_vm12 = vcmp.eq.s32.totalorder %v3495_v15, %v2855_v6 }
 0x28d   : > { %2079 = vset.pattern.permute.xlu1 %v4070_v27 }
 0x28e   : > { %1392 = vperm.xlu1 %2079, %v3218_v56   ;;  %v1167_v23 = vpop.permute.xlu1 %1166  ;;  %1395 = vperm.xlu2 %2077, %v3224_v35  }
 0x28f   : > { %v1202_v4 = vsel %vm1122_vm13, %v1167_v23, 0.0  ;;  %1470 = vperm.xlu0 %2078, %v3267_v24   ;;  %v3503_v20 = vpop.permute.xlu2 %1235 }
 0x290   : > { %v3506_v32 = vadd.f32 %v1202_v4, %v3240_v19  ;;  %v3508_v8 = vpop.permute.xlu0 %1253  ;;  %vm1276_vm10 = vcmp.eq.s32.totalorder %v3503_v20, %v2855_v6 }
 0x291   : > { %vm1282_vm13 = vcmp.eq.s32.totalorder %v3508_v8, %v2855_v6 }
 0x296   : > { %1398 = vperm.xlu1 %2079, %v3254_v28   ;;  %v1179_v21 = vpop.permute.xlu1 %1178  ;;  %1401 = vperm.xlu2 %2077, %v3260_v13  }
 0x297   : > { %v1205_v56 = vsel %vm1125_vm14, %v1179_v21, 0.0  ;;  %1482 = vperm.xlu0 %2078, %v3298_v52   ;;  %v1242_v35 = vpop.permute.xlu2 %1241 }
 0x298   : > { %v3516_v24 = vadd.f32 %v1205_v56, %v3274_v29  ;;  %v3518_v43 = vpop.permute.xlu0 %1262  ;;  %vm1278_vm0 = vcmp.eq.s32.totalorder %v1242_v35, %v2855_v6 }
 0x299   : > { %vm1285_vm14 = vcmp.eq.s32.totalorder %v3518_v43, %v2855_v6 }
 0x29e   : > { %1407 = vperm.xlu1 %2079, %v3286_v11   ;;  %v1191_v19 = vpop.permute.xlu1 %1190  ;;  %1410 = vperm.xlu2 %2077, %v3292_v0  }
 0x29f   : > { %v1208_v28 = vsel %vm1128_vm15, %v1191_v19, 0.0  ;;  %1494 = vperm.xlu0 %2078, %v3320_v53   ;;  %v1251_v13 = vpop.permute.xlu2 %1250 }
 0x2a0   : > { %v3526_v52 = vadd.f32 %v1208_v28, %v3301_v47  ;;  %v3528_v63 = vpop.permute.xlu0 %1271  ;;  %vm1281_vm3 = vcmp.eq.s32.totalorder %v1251_v13, %v2855_v6 }
 0x2a1   : > { %vm1288_vm15 = vcmp.eq.s32.totalorder %v3528_v63, %v2855_v6 }
 0x2a6   : > { %1416 = vperm.xlu1 %2079, %v3308_v33   ;;  %1419 = vperm.xlu2 %2077, %v3314_v45  }
 0x2a7   : > { %1506 = vperm.xlu0 %2078, %v3342_v26   ;;  %v1233_v29 = vpop.permute.xlu1 %1232  ;;  %v1260_v11 = vpop.permute.xlu2 %1259 }
 0x2a8   : > { %vm1275_vm1 = vcmp.eq.s32.totalorder %v1233_v29, %v2855_v6  ;;  %v1299_v0 = vpop.permute.xlu0 %1298  ;;  %vm1284_vm5 = vcmp.eq.s32.totalorder %v1260_v11, %v2855_v6 }
 0x2a9   : > { %v1355_v18 = vsel %vm1275_vm1, %v1299_v0, 0.0 }
 0x2aa   : > { %v3535_v53 = vadd.f32 %v1355_v18, %v3349_v36 }
 0x2ae   : > { %1425 = vperm.xlu1 %2079, %v3330_v48   ;;  %1428 = vperm.xlu2 %2077, %v3336_v54  }
 0x2af   : > { %v1239_v47 = vpop.permute.xlu1 %1238  ;;  %v1269_v60 = vpop.permute.xlu2 %1268 }
 0x2b0   : > { %v1311_v33 = vpop.permute.xlu0 %1310  ;;  %vm1277_vm4 = vcmp.eq.s32.totalorder %v1239_v47, %v2855_v6  ;;  %vm1287_vm8 = vcmp.eq.s32.totalorder %v1269_v60, %v2855_v6 }
 0x2b1   : > { %v1358_v45 = vsel %vm1278_vm0, %v1311_v33, 0.0 }
 0x2b2   : > { %v3541_v26 = vadd.f32 %v1358_v45, %v3374_v46 }
 0x2b6   : > { %1450 = vperm.xlu1 %2079, %v3356_v50   ;;  %1454 = vperm.xlu2 %2077, %v3362_v1  }
 0x2b7   : > { %v1248_v36 = vpop.permute.xlu1 %1247  ;;  %v1295_v48 = vpop.permute.xlu2 %1294 }
 0x2b8   : > { %v1354_v54 = vsel %vm1274_vm2, %v1295_v48, 0.0  ;;  %v1323_v34 = vpop.permute.xlu0 %1322  ;;  %vm1280_vm6 = vcmp.eq.s32.totalorder %v1248_v36, %v2855_v6 }
 0x2b9   : > { %v3549_v30 = vadd.f32 %v1354_v54, %v3371_v3  ;;  %v1361_v31 = vsel %vm1281_vm3, %v1323_v34, 0.0 }
 0x2ba   : > { %v3552_v46 = vadd.f32 %v1361_v31, %v3397_v40  ;;  %v4073_v40 = vld [vmem:[#allocation92_spill] sm:$0xff] }
 0x2be   : > { %1462 = vperm.xlu1 %2079, %v3379_v5   ;;  %1466 = vperm.xlu2 %2077, %v4071_v10   ;;  %v4074_v5 = vld [vmem:[#allocation50_spill] sm:$0xff] }
 0x2bf   : > { %v1257_v50 = vpop.permute.xlu1 %1256  ;;  %v1307_v1 = vpop.permute.xlu2 %1306 }
 0x2c0   : > { %v1357_v62 = vsel %vm1277_vm4, %v1307_v1, 0.0  ;;  %v1335_v17 = vpop.permute.xlu0 %1334  ;;  %vm1283_vm7 = vcmp.eq.s32.totalorder %v1257_v50, %v2855_v6 }
 0x2c1   : > { %v3559_v49 = vadd.f32 %v1357_v62, %v4072_v37  ;;  %v1364_v3 = vsel %vm1284_vm5, %v1335_v17, 0.0 }
 0x2c2   : > { %v3562_v55 = vadd.f32 %v1364_v3, %v3431_v57 }
 0x2c6   : > { %1474 = vperm.xlu1 %2079, %v4073_v40   ;;  %1478 = vperm.xlu2 %2077, %v4074_v5  }
 0x2c7   : > { %v1266_v59 = vpop.permute.xlu1 %1265  ;;  %v1319_v61 = vpop.permute.xlu2 %1318 }
 0x2c8   : > { %v1360_v27 = vsel %vm1280_vm6, %v1319_v61, 0.0  ;;  %v1347_v39 = vpop.permute.xlu0 %1346  ;;  %vm1286_vm11 = vcmp.eq.s32.totalorder %v1266_v59, %v2855_v6 }
 0x2c9   : > { %v3569_v38 = vadd.f32 %v1360_v27, %v3427_v25  ;;  %v1367_v23 = vsel %vm1287_vm8, %v1347_v39, 0.0 }
 0x2ca   : > { %v3572_v4 = vadd.f32 %v1367_v23, %v3458_v44 }
 0x2ce   : > { %1486 = vperm.xlu1 %2079, %v3436_v22   ;;  %1490 = vperm.xlu2 %2077, %v3442_v7  }
 0x2cf   : > { %v1291_v57 = vpop.permute.xlu1 %1290  ;;  %v1331_v21 = vpop.permute.xlu2 %1330 }
 0x2d0   : > { %v1353_v56 = vsel %vm1273_vm9, %v1291_v57, 0.0  ;;  %v1363_v35 = vsel %vm1283_vm7, %v1331_v21, 0.0 }
 0x2d1   : > { %v3580_v25 = vadd.f32 %v1353_v56, %v3452_v9  ;;  %v3583_v19 = vadd.f32 %v1363_v35, %v3455_v12  ;;  %v1390_v44 = vpop.permute.xlu0 %1389 }
 0x2d2   : > { %vm1434_vm3 = vcmp.eq.s32.totalorder %v1390_v44, %v2855_v6 }
 0x2d6   : > { %1498 = vperm.xlu1 %2079, %v3463_v16   ;;  %1502 = vperm.xlu2 %2077, %v3469_v58  }
 0x2d7   : > { %v1303_v22 = vpop.permute.xlu1 %1302  ;;  %v1343_v7 = vpop.permute.xlu2 %1342 }
 0x2d8   : > { %v1356_v51 = vsel %vm1276_vm10, %v1303_v22, 0.0  ;;  %v1366_v28 = vsel %vm1286_vm11, %v1343_v7, 0.0 }
 0x2d9   : > { %v3591_v9 = vadd.f32 %v1356_v51, %v3477_v41  ;;  %v3594_v12 = vadd.f32 %v1366_v28, %v3480_v2  ;;  %v3596_v13 = vpop.permute.xlu0 %1404 }
 0x2de   : > { %1510 = vperm.xlu1 %2079, %v3175_v14  }
 0x2df   : > { %v1315_v16 = vpop.permute.xlu1 %1314 }
 0x2e0   : > { %v1359_v58 = vsel %vm1279_vm12, %v1315_v16, 0.0  ;;  %v3601_v20 = vpop.permute.xlu2 %1386  ;;  %vm1439_vm12 = vcmp.eq.s32.totalorder %v3596_v13, %v2855_v6  ;;  %v1569_v13 = vld [vmem:[%s3829_s2 + $0x40] sm:$0xff] }
 0x2e1   : > { %v3604_v29 = vadd.f32 %v1359_v58, %v3493_v42  ;;  %v3606_v11 = vpop.permute.xlu0 %1413  ;;  %vm1433_vm9 = vcmp.eq.s32.totalorder %v3601_v20, %v2855_v6  ;;  %1585 = vst [vmem:[#allocation2 + $0x40] sm:$0xff] %v1569_v13 }
 0x2e7   : > { %v1327_v41 = vpop.permute.xlu1 %1326 }
 0x2e8   : > { %v1362_v2 = vsel %vm1282_vm13, %v1327_v41, 0.0  ;;  %v3610_v0 = vpop.permute.xlu2 %1395  ;;  %vm1442_vm13 = vcmp.eq.s32.totalorder %v3606_v11, %v2855_v6  ;;  %v1576_v11 = vld [vmem:[%s3829_s2 + $0x78] sm:$0xff] }
 0x2e9   : > { %v3613_v14 = vadd.f32 %v1362_v2, %v3506_v32  ;;  %v3615_v15 = vpop.permute.xlu0 %1422  ;;  %vm1436_vm10 = vcmp.eq.s32.totalorder %v3610_v0, %v2855_v6  ;;  %v1563_v2 = vld [vmem:[%s3829_s2 + $0x10] sm:$0xff]  ;;  %1592 = vst [vmem:[#allocation2 + $0x28] sm:$0xff] %v1576_v11 }
 0x2ea   : > { %1579 = vst [vmem:[#allocation2 + $0x58] sm:$0xff] %v1563_v2 }
 0x2ef   : > { %v1339_v18 = vpop.permute.xlu1 %1338 }
 0x2f0   : > { %v1365_v42 = vsel %vm1285_vm14, %v1339_v18, 0.0  ;;  %v1402_v47 = vpop.permute.xlu2 %1401  ;;  %v1566_v18 = vld [vmem:[%s3829_s2 + $0x28] sm:$0xff]  ;;  %vm1445_vm14 = vcmp.eq.s32.totalorder %v3615_v15, %v2855_v6 }
 0x2f1   : > { %v3620_v60 = vadd.f32 %v1365_v42, %v3516_v24  ;;  %v3622_v33 = vpop.permute.xlu0 %1431  ;;  %vm1438_vm1 = vcmp.eq.s32.totalorder %v1402_v47, %v2855_v6  ;;  %1582 = vst [vmem:[#allocation2 + $0x68] sm:$0xff] %v1566_v18 }
 0x2f7   : > { %v1351_v8 = vpop.permute.xlu1 %1350 }
 0x2f8   : > { %v1368_v45 = vsel %vm1288_vm15, %v1351_v8, 0.0  ;;  %v1411_v32 = vpop.permute.xlu2 %1410  ;;  %v1567_v8 = vld [vmem:[%s3829_s2 + $0x30] sm:$0xff]  ;;  %vm1448_vm15 = vcmp.eq.s32.totalorder %v3622_v33, %v2855_v6 }
 0x2f9   : > { %v3627_v36 = vadd.f32 %v1368_v45, %v3526_v52  ;;  %v1459_v48 = vpop.permute.xlu0 %1458  ;;  %vm1441_vm2 = vcmp.eq.s32.totalorder %v1411_v32, %v2855_v6  ;;  %v1568_v45 = vld [vmem:[%s3829_s2 + $0x38] sm:$0xff]  ;;  %v1570_v32 = vld [vmem:[%s3829_s2 + $0x48] sm:$0xff]  ;;  %1583 = vst [vmem:[#allocation2 + $0x8] sm:$0xff] %v1567_v8 }
 0x2fa   : > { %1584 = vst [vmem:[#allocation2 + $0x48] sm:$0xff] %v1568_v45 }
 0x2fb   : > { %1586 = vst [vmem:[#allocation2 + $0x20] sm:$0xff] %v1570_v32 }
 0x300   : > { %v1393_v43 = vpop.permute.xlu1 %1392  ;;  %v1420_v54 = vpop.permute.xlu2 %1419 }
 0x301   : > { %vm1435_vm0 = vcmp.eq.s32.totalorder %v1393_v43, %v2855_v6  ;;  %v1471_v24 = vpop.permute.xlu0 %1470  ;;  %vm1444_vm4 = vcmp.eq.s32.totalorder %v1420_v54, %v2855_v6  ;;  %v1573_v54 = vld [vmem:[%s3829_s2 + $0x60] sm:$0xff] }
 0x302   : > { %v1515_v34 = vsel %vm1435_vm0, %v1459_v48, 0.0  ;;  %v1518_v31 = vsel %vm1438_vm1, %v1471_v24, 0.0  ;;  %v1572_v48 = vld [vmem:[%s3829_s2 + $0x58] sm:$0xff]  ;;  %1589 = vst [vmem:[#allocation2 + $0x60] sm:$0xff] %v1573_v54 }
 0x303   : > { %v1531_v10 = vadd.f32 %v1515_v34, %v3535_v53  ;;  %v1534_v63 = vadd.f32 %v1518_v31, %v3541_v26  ;;  %v1574_v31 = vld [vmem:[%s3829_s2 + $0x68] sm:$0xff]  ;;  %1588 = vst [vmem:[#allocation2 + $0x38] sm:$0xff] %v1572_v48 }
 0x304   : > { %1590 = vst [vmem:[#allocation2 + $0x70] sm:$0xff] %v1574_v31 }
 0x305   : > { %1547 = vst [vmem:[#allocation3 + $0x10] sm:$0xff] %v1531_v10  ;;  %v1575_v10 = vld [vmem:[%s3829_s2 + $0x70] sm:$0xff] }
 0x306   : > { %1550 = vst [vmem:[#allocation3 + $0x30] sm:$0xff] %v1534_v63 }
 0x307   : > { %1591 = vst [vmem:[#allocation2 + $0x78] sm:$0xff] %v1575_v10 }
 0x308   : > { %v1399_v50 = vpop.permute.xlu1 %1398  ;;  %v1429_v1 = vpop.permute.xlu2 %1428 }
 0x309   : > { %v1483_v52 = vpop.permute.xlu0 %1482  ;;  %vm1437_vm5 = vcmp.eq.s32.totalorder %v1399_v50, %v2855_v6  ;;  %vm1447_vm6 = vcmp.eq.s32.totalorder %v1429_v1, %v2855_v6 }
 0x30a   : > { %v1521_v62 = vsel %vm1441_vm2, %v1483_v52, 0.0 }
 0x30b   : > { %v1537_v17 = vadd.f32 %v1521_v62, %v3552_v46 }
 0x30d   : > { %1553 = vst [vmem:[#allocation3 + $0x20] sm:$0xff] %v1537_v17 }
 0x310   : > { %v1408_v37 = vpop.permute.xlu1 %1407  ;;  %v1455_v3 = vpop.permute.xlu2 %1454 }
 0x311   : > { %v1514_v53 = vsel %vm1434_vm3, %v1455_v3, 0.0  ;;  %v1495_v40 = vpop.permute.xlu0 %1494  ;;  %vm1440_vm8 = vcmp.eq.s32.totalorder %v1408_v37, %v2855_v6 }
 0x312   : > { %v1530_v26 = vadd.f32 %v1514_v53, %v3549_v30  ;;  %v1524_v5 = vsel %vm1444_vm4, %v1495_v40, 0.0 }
 0x313   : > { %v1540_v59 = vadd.f32 %v1524_v5, %v3562_v55 }
 0x314   : > { %1546 = vst [vmem:[#allocation3 + $0x68] sm:$0xff] %v1530_v26 }
 0x315   : > { %1556 = vst [vmem:[#allocation3 + $0x58] sm:$0xff] %v1540_v59 }
 0x318   : > { %v1417_v61 = vpop.permute.xlu1 %1416  ;;  %v1467_v46 = vpop.permute.xlu2 %1466 }
 0x319   : > { %v1517_v27 = vsel %vm1437_vm5, %v1467_v46, 0.0  ;;  %v1507_v39 = vpop.permute.xlu0 %1506  ;;  %vm1443_vm7 = vcmp.eq.s32.totalorder %v1417_v61, %v2855_v6 }
 0x31a   : > { %v1533_v23 = vadd.f32 %v1517_v27, %v3559_v49  ;;  %v1527_v57 = vsel %vm1447_vm6, %v1507_v39, 0.0 }
 0x31b   : > { %v1543_v21 = vadd.f32 %v1527_v57, %v3572_v4 }
 0x31c   : > { %1549 = vst [vmem:[#allocation3 + $0x48] sm:$0xff] %v1533_v23 }
 0x31d   : > { %1559 = vst [vmem:[#allocation3 + $0x60] sm:$0xff] %v1543_v21 }
 0x320   : > { %v1426_v30 = vpop.permute.xlu1 %1425  ;;  %v1479_v55 = vpop.permute.xlu2 %1478 }
 0x321   : > { %v1520_v56 = vsel %vm1440_vm8, %v1479_v55, 0.0  ;;  %vm1446_vm11 = vcmp.eq.s32.totalorder %v1426_v30, %v2855_v6 }
 0x322   : > { %v1536_v35 = vadd.f32 %v1520_v56, %v3569_v38 }
 0x324   : > { %1552 = vst [vmem:[#allocation3 + $0x38] sm:$0xff] %v1536_v35 }
 0x328   : > { %v1451_v44 = vpop.permute.xlu1 %1450  ;;  %v1491_v49 = vpop.permute.xlu2 %1490 }
 0x329   : > { %v1513_v22 = vsel %vm1433_vm9, %v1451_v44, 0.0  ;;  %v1523_v7 = vsel %vm1443_vm7, %v1491_v49, 0.0 }
 0x32a   : > { %v1529_v4 = vadd.f32 %v1513_v22, %v3580_v25  ;;  %v1539_v51 = vadd.f32 %v1523_v7, %v3583_v19  ;;  %v1561_v25 = vld [vmem:[%s3829_s2] sm:$0xff]  ;;  %v1562_v19 = vld [vmem:[%s3829_s2 + $0x8] sm:$0xff] }
 0x32b   : > { %1577 = vst [vmem:[#allocation2 + $0x30] sm:$0xff] %v1561_v25 }
 0x32c   : > { %1545 = vst [vmem:[#allocation3 + $0x28] sm:$0xff] %v1529_v4 }
 0x32d   : > { %1555 = vst [vmem:[#allocation3 + $0x18] sm:$0xff] %v1539_v51 }
 0x32e   : > { %1578 = vst [vmem:[#allocation2] sm:$0xff] %v1562_v19 }
 0x330   : > { %v1463_v38 = vpop.permute.xlu1 %1462  ;;  %v1503_v28 = vpop.permute.xlu2 %1502 }
 0x331   : > { %v1516_v16 = vsel %vm1436_vm10, %v1463_v38, 0.0  ;;  %v1526_v58 = vsel %vm1446_vm11, %v1503_v28, 0.0 }
 0x332   : > { %v1532_v20 = vadd.f32 %v1516_v16, %v3591_v9  ;;  %v1542_v41 = vadd.f32 %v1526_v58, %v3594_v12  ;;  %v1564_v9 = vld [vmem:[%s3829_s2 + $0x18] sm:$0xff]  ;;  %v1565_v12 = vld [vmem:[%s3829_s2 + $0x20] sm:$0xff] }
 0x333   : > { %1580 = vst [vmem:[#allocation2 + $0x18] sm:$0xff] %v1564_v9 }
 0x334   : > { %1548 = vst [vmem:[#allocation3 + $0x40] sm:$0xff] %v1532_v20 }
 0x335   : > { %1558 = vst [vmem:[#allocation3 + $0x8] sm:$0xff] %v1542_v41 }
 0x336   : > { %1581 = vst [vmem:[#allocation2 + $0x50] sm:$0xff] %v1565_v12 }
 0x338   : > { %v1475_v0 = vpop.permute.xlu1 %1474 }
 0x339   : > { %v1519_v42 = vsel %vm1439_vm12, %v1475_v0, 0.0 }
 0x33a   : > { %v1535_v47 = vadd.f32 %v1519_v42, %v3604_v29  ;;  %v1571_v29 = vld [vmem:[%s3829_s2 + $0x50] sm:$0xff] }
 0x33b   : > { %1587 = vst [vmem:[#allocation2 + $0x10] sm:$0xff] %v1571_v29 }
 0x33c   : > { %1551 = vst [vmem:[#allocation3 + $0x70] sm:$0xff] %v1535_v47 }
 0x340   : > { %v1487_v43 = vpop.permute.xlu1 %1486 }
 0x341   : > { %v1522_v24 = vsel %vm1442_vm13, %v1487_v43, 0.0 }
 0x342   : > { %v1538_v34 = vadd.f32 %v1522_v24, %v3613_v14 }
 0x344   : > { %1554 = vst [vmem:[#allocation3 + $0x78] sm:$0xff] %v1538_v34 }
 0x348   : > { %v1499_v14 = vpop.permute.xlu1 %1498 }
 0x349   : > { %v1525_v63 = vsel %vm1445_vm14, %v1499_v14, 0.0 }
 0x34a   : > { %v1541_v50 = vadd.f32 %v1525_v63, %v3620_v60 }
 0x34c   : > { %1557 = vst [vmem:[#allocation3] sm:$0xff] %v1541_v50 }
 0x350   : > { %v1511_v1 = vpop.permute.xlu1 %1510 }
 0x351   : > { %v1528_v52 = vsel %vm1448_vm15, %v1511_v1, 0.0 }
 0x352   : > { %v1544_v62 = vadd.f32 %v1528_v52, %v3627_v36 }
 0x354   : > { %1560 = vst [vmem:[#allocation3 + $0x50] sm:$0xff] %v1544_v62 }
 0x355 PF: > { %v2163_v17 = vmov 0   ;;  %v4076_v60 = vld [vmem:[#allocation15_spill] sm:$0xff]  ;;  %v4079_v36 = vld [vmem:[#allocation16_spill] sm:$0xff]  ;;  %v1720_v37 = vld [vmem:[%s2287_s6 + $0x78] sm:$0xff]  ;;  %p1992_p5 = scmp.ne.s32.totalorder %s2203_s19, 1 }
 0x356   : > { %2113 = vset.pattern.permute.xlu1 %v2163_v17  ;;  %2112 = vset.pattern.permute.xlu0 %v2163_v17  ;;  %v4075_v15 = vld [vmem:[#allocation17_spill] sm:$0xff]  ;;  %v4078_v33 = vld [vmem:[#allocation7_spill] sm:$0xff]  ;;  %v4080_v53 = vld [vmem:[#allocation8_spill] sm:$0xff] }
 0x357   : > { %1661 = vperm.xlu1 %2113, %v4075_v15   ;;  %1651 = vperm.xlu0 %2112, %v4076_v60   ;;  %v4077_v6 = vld [vmem:[#allocation18_spill] sm:$0xff]  ;;  %v1719_v3 = vld [vmem:[%s2287_s6 + $0x70] sm:$0xff]  ;;  %v1718_v40 = vld [vmem:[%s2287_s6 + $0x68] sm:$0xff] }
 0x358   : > { %2114 = vset.pattern.permute.xlu2 %v2163_v17  ;;  %1998 = vmatpush.msra.mxu2 %v1720_v37  ;;  %v1717_v26 = vld [vmem:[%s2287_s6 + $0x60] sm:$0xff]  ;;  %v1716_v5 = vld [vmem:[%s2287_s6 + $0x58] sm:$0xff]  ;;  %v4081_v59 = vld [vmem:[#allocation9_spill] sm:$0xff] }
 0x359   : > { %1666 = vperm.xlu2 %2114, %v4077_v6   ;;  %1721 = vmatpush.msra.mxu0 %v1720_v37  ;;  %v4082_v61 = vld [vmem:[#allocation19_spill] sm:$0xff]  ;;  %v1715_v46 = vld [vmem:[%s2287_s6 + $0x50] sm:$0xff]  ;;  %v4083_v27 = vld [vmem:[#allocation20_spill] sm:$0xff] }
 0x35a   : > { %1999 = vmatpush.msra.mxu2 %v1719_v3  ;;  %v1714_v39 = vld [vmem:[%s2287_s6 + $0x48] sm:$0xff]  ;;  %v1713_v23 = vld [vmem:[%s2287_s6 + $0x40] sm:$0xff]  ;;  %v1712_v57 = vld [vmem:[%s2287_s6 + $0x38] sm:$0xff] }
 0x35b   : > { %1722 = vmatpush.msra.mxu0 %v1719_v3  ;;  %v4084_v21 = vld [vmem:[#allocation21_spill] sm:$0xff]  ;;  %v4085_v30 = vld [vmem:[#allocation10_spill] sm:$0xff]  ;;  %v4086_v56 = vld [vmem:[#allocation11_spill] sm:$0xff] }
 0x35c   : > { %2000 = vmatpush.msra.mxu2 %v1718_v40  ;;  %v1711_v55 = vld [vmem:[%s2287_s6 + $0x30] sm:$0xff]  ;;  %v4087_v35 = vld [vmem:[#allocation12_spill] sm:$0xff]  ;;  %v4088_v44 = vld [vmem:[#allocation22_spill] sm:$0xff] }
 0x35d   : > { %1723 = vmatpush.msra.mxu0 %v1718_v40  ;;  %v4089_v49 = vld [vmem:[#allocation13_spill] sm:$0xff]  ;;  %v4090_v22 = vld [vmem:[#allocation14_spill] sm:$0xff]  ;;  %v1710_v7 = vld [vmem:[%s2287_s6 + $0x28] sm:$0xff] }
 0x35e   : > { %2001 = vmatpush.msra.mxu2 %v1717_v26  ;;  %v1709_v4 = vld [vmem:[%s2287_s6 + $0x20] sm:$0xff]  ;;  %v1708_v51 = vld [vmem:[%s2287_s6 + $0x18] sm:$0xff]  ;;  %v1707_v38 = vld [vmem:[%s2287_s6 + $0x10] sm:$0xff] }
 0x35f   : > { %1611 = vperm.xlu1 %2113, %v4078_v33   ;;  %1656 = vperm.xlu0 %2112, %v4079_v36   ;;  %v1706_v28 = vld [vmem:[%s2287_s6 + $0x8] sm:$0xff]  ;;  %v1705_v16 = vld [vmem:[%s2287_s6] sm:$0xff]  ;;  %v1593_v2 = vld [vmem:[#allocation2 + $0x30] sm:$0xff] }
 0x360   : > { %1724 = vmatpush.msra.mxu0 %v1717_v26  ;;  %2002 = vmatpush.msra.mxu2 %v1716_v5  ;;  %v1601_v58 = vld [vmem:[#allocation2 + $0x40] sm:$0xff]  ;;  %v1603_v45 = vld [vmem:[#allocation2 + $0x10] sm:$0xff]  ;;  %v1595_v43 = vld [vmem:[#allocation2 + $0x58] sm:$0xff] }
 0x361   : > { %1616 = vperm.xlu2 %2114, %v4080_v53   ;;  %v1602_v9 = vld [vmem:[#allocation2 + $0x20] sm:$0xff]  ;;  %v1604_v54 = vld [vmem:[#allocation2 + $0x38] sm:$0xff]  ;;  %v1597_v52 = vld [vmem:[#allocation2 + $0x50] sm:$0xff] }
 0x362   : > { %1725 = vmatpush.msra.mxu0 %v1716_v5  ;;  %2003 = vmatpush.msra.mxu2 %v1715_v46  ;;  %v1594_v47 = vld [vmem:[#allocation2] sm:$0xff]  ;;  %v1596_v11 = vld [vmem:[#allocation2 + $0x18] sm:$0xff]  ;;  %v1606_v62 = vld [vmem:[#allocation2 + $0x70] sm:$0xff] }
 0x363   : > { %v1605_v14 = vld [vmem:[#allocation2 + $0x60] sm:$0xff]  ;;  %v1598_v33 = vld [vmem:[#allocation2 + $0x68] sm:$0xff]  ;;  %v1607_v36 = vld [vmem:[#allocation2 + $0x78] sm:$0xff] }
 0x364   : > { %1726 = vmatpush.msra.mxu0 %v1715_v46  ;;  %2004 = vmatpush.msra.mxu2 %v1714_v39  ;;  %v1599_v26 = vld [vmem:[#allocation2 + $0x8] sm:$0xff] }
 0x365   : > { %v1608_v5 = vld [vmem:[#allocation2 + $0x28] sm:$0xff] }
 0x366   : > { %1727 = vmatpush.msra.mxu0 %v1714_v39  ;;  %2005 = vmatpush.msra.mxu2 %v1713_v23 }
 0x367   : > { %1621 = vperm.xlu1 %2113, %v4081_v59   ;;  %1671 = vperm.xlu0 %2112, %v4082_v61  }
 0x368   : > { %1728 = vmatpush.msra.mxu0 %v1713_v23  ;;  %2006 = vmatpush.msra.mxu2 %v1712_v57 }
 0x369   : > { %1676 = vperm.xlu2 %2114, %v4083_v27   ;;  %v1600_v27 = vld [vmem:[#allocation2 + $0x48] sm:$0xff] }
 0x36a   : > { %1729 = vmatpush.msra.mxu0 %v1712_v57  ;;  %2007 = vmatpush.msra.mxu2 %v1711_v55 }
 0x36c   : > { %1730 = vmatpush.msra.mxu0 %v1711_v55  ;;  %2008 = vmatpush.msra.mxu2 %v1710_v7 }
 0x36e   : > { %1731 = vmatpush.msra.mxu0 %v1710_v7  ;;  %2009 = vmatpush.msra.mxu2 %v1709_v4 }
 0x36f   : > { %1681 = vperm.xlu1 %2113, %v4084_v21   ;;  %1626 = vperm.xlu0 %2112, %v4085_v30  }
 0x370   : > { %1732 = vmatpush.msra.mxu0 %v1709_v4  ;;  %2010 = vmatpush.msra.mxu2 %v1708_v51 }
 0x371   : > { %1631 = vperm.xlu2 %2114, %v4086_v56  }
 0x372   : > { %1733 = vmatpush.msra.mxu0 %v1708_v51  ;;  %2011 = vmatpush.msra.mxu2 %v1707_v38 }
 0x374   : > { %1734 = vmatpush.msra.mxu0 %v1707_v38  ;;  %2012 = vmatpush.msra.mxu2 %v1706_v28 }
 0x376   : > { %1735 = vmatpush.msra.mxu0 %v1706_v28  ;;  %2013 = vmatpush.msra.mxu2 %v1705_v16 }
 0x377   : > { %1636 = vperm.xlu1 %2113, %v4087_v35   ;;  %1686 = vperm.xlu0 %2112, %v4088_v44  }
 0x378   : > { %1736 = vmatpush.msra.mxu0 %v1705_v16 }
 0x379   : > { %1641 = vperm.xlu2 %2114, %v4089_v49  }
 0x37f   : > { %1646 = vperm.xlu0 %2112, %v4090_v22  }
 0x3b3   : > { %v3752_v19 = vpop.permute.xlu2 %1666 }
 0x3b4   : > { %v1700_v34 = vmul.f32 %v3752_v19, %v1604_v54  ;;  %v1799_v54 = vld [vmem:[#allocation3 + $0x8] sm:$0xff] }
 0x3bb   : > { %v3760_v8 = vpop.permute.xlu2 %1616 }
 0x3bc   : > { %v1690_v13 = vmul.f32 %v3760_v8, %v1594_v47  ;;  %v1789_v47 = vld [vmem:[#allocation3 + $0x40] sm:$0xff] }
 0x3c3   : > { %v3770_v31 = vpop.permute.xlu2 %1676 }
 0x3c4   : > { %v1702_v60 = vmul.f32 %v3770_v31, %v1606_v62 }
 0x3c9   : > { %v3747_v20 = vpop.permute.xlu1 %1661  ;;  %v3749_v41 = vpop.permute.xlu0 %1651 }
 0x3ca   : > { %v1697_v25 = vmul.f32 %v3749_v41, %v1601_v58  ;;  %v1699_v32 = vmul.f32 %v3747_v20, %v1603_v45  ;;  %v1786_v58 = vld [vmem:[#allocation3 + $0x28] sm:$0xff]  ;;  %v1797_v45 = vld [vmem:[#allocation3 + $0x58] sm:$0xff] }
 0x3cb   : > { %v3778_v17 = vpop.permute.xlu2 %1631 }
 0x3cc   : > { %1761 = vmatmul.f32.vlgmr.msra.gmra.mxu2 %v1697_v25  ;;  %v1693_v15 = vmul.f32 %v3778_v17, %v1597_v52  ;;  %v1794_v25 = vld [vmem:[#allocation3 + $0x20] sm:$0xff] }
 0x3d1   : > { %v3754_v12 = vpop.permute.xlu1 %1611  ;;  %v3756_v0 = vpop.permute.xlu0 %1656 }
 0x3d2   : > { %v1689_v18 = vmul.f32 %v3754_v12, %v1593_v2  ;;  %v1698_v42 = vmul.f32 %v3756_v0, %v1602_v9  ;;  %v1787_v2 = vld [vmem:[#allocation3 + $0x68] sm:$0xff]  ;;  %v1795_v9 = vld [vmem:[#allocation3 + $0x78] sm:$0xff] }
 0x3d3   : > { %v3788_v40 = vpop.permute.xlu2 %1641 }
 0x3d4   : > { %1737 = vmatmul.f32.vlgmr.msra.gmra.mxu0 %v1689_v18  ;;  %1764 = vmatmul.f32.gmra.mxu2 %v1698_v42  ;;  %v1695_v59 = vmul.f32 %v3788_v40, %v1599_v26  ;;  %v1788_v18 = vld [vmem:[#allocation3 + $0x10] sm:$0xff]  ;;  %v1796_v42 = vld [vmem:[#allocation3 + $0x18] sm:$0xff] }
 0x3d9   : > { %v3764_v29 = vpop.permute.xlu0 %1671  ;;  %v3766_v48 = vpop.permute.xlu1 %1621 }
 0x3da   : > { %v1691_v24 = vmul.f32 %v3766_v48, %v1595_v43  ;;  %v1701_v50 = vmul.f32 %v3764_v29, %v1605_v14  ;;  %v1791_v43 = vld [vmem:[#allocation3 + $0x30] sm:$0xff] }
 0x3db   : > { %v1801_v14 = vld [vmem:[#allocation3 + $0x50] sm:$0xff] }
 0x3dc   : > { %1740 = vmatmul.f32.gmra.mxu0 %v1690_v13  ;;  %1767 = vmatmul.f32.gmra.mxu2 %v1699_v32  ;;  %v1790_v13 = vld [vmem:[#allocation3 + $0x48] sm:$0xff]  ;;  %v1798_v32 = vld [vmem:[#allocation3] sm:$0xff] }
 0x3e1   : > { %v3772_v10 = vpop.permute.xlu0 %1626  ;;  %v3776_v1 = vpop.permute.xlu1 %1681 }
 0x3e2   : > { %v1692_v63 = vmul.f32 %v3772_v10, %v1596_v11  ;;  %v1703_v3 = vmul.f32 %v3776_v1, %v1607_v36  ;;  %v1793_v11 = vld [vmem:[#allocation3 + $0x38] sm:$0xff] }
 0x3e4   : > { %1743 = vmatmul.f32.gmra.mxu0 %v1691_v24  ;;  %1770 = vmatmul.f32.gmra.mxu2 %v1700_v34  ;;  %v1792_v24 = vld [vmem:[#allocation3 + $0x70] sm:$0xff]  ;;  %v1800_v34 = vld [vmem:[#allocation3 + $0x60] sm:$0xff] }
 0x3e9   : > { %v3782_v6 = vpop.permute.xlu1 %1636  ;;  %v3786_v53 = vpop.permute.xlu0 %1686 }
 0x3ea   : > { %v1694_v37 = vmul.f32 %v3782_v6, %v1598_v33  ;;  %v1704_v61 = vmul.f32 %v3786_v53, %v1608_v5 }
 0x3ec   : > { %1746 = vmatmul.f32.gmra.mxu0 %v1692_v63  ;;  %1773 = vmatmul.f32.gmra.mxu2 %v1701_v50 }
 0x3f1   : > { %v3792_v46 = vpop.permute.xlu0 %1646 }
 0x3f2   : > { %v1696_v39 = vmul.f32 %v3792_v46, %v1600_v27 }
 0x3f4   : > { %1749 = vmatmul.f32.gmra.mxu0 %v1693_v15  ;;  %1776 = vmatmul.f32.gmra.mxu2 %v1702_v60 }
 0x3fc   : > { %1752 = vmatmul.f32.gmra.mxu0 %v1694_v37  ;;  %1779 = vmatmul.f32.gmra.mxu2 %v1703_v3 }
 0x404   : > { %1755 = vmatmul.f32.gmra.mxu0 %v1695_v59  ;;  %1782 = vmatmul.f32.gmra.mxu2 %v1704_v61 }
 0x40c   : > { %1758 = vmatmul.f32.gmra.mxu0 %v1696_v39 }
 0x44f   : > { %v1762_v23 = vpop.f32.mrf.mxu2 }
 0x451   : > { %v1738_v57 = vpop.f32.mrf.mxu0 }
 0x457   : > { %v1765_v21 = vpop.f32.mrf.mxu2 }
 0x459   : > { %v1741_v30 = vpop.f32.mrf.mxu0 }
 0x45f   : > { %v1768_v55 = vpop.f32.mrf.mxu2 }
 0x461   : > { %v1744_v56 = vpop.f32.mrf.mxu0 }
 0x467   : > { %v1771_v35 = vpop.f32.mrf.mxu2 }
 0x469   : > { %v1747_v44 = vpop.f32.mrf.mxu0 }
 0x46f   : > { %v1774_v49 = vpop.f32.mrf.mxu2 }
 0x471   : > { %v1750_v7 = vpop.f32.mrf.mxu0 }
 0x477   : > { %v1777_v22 = vpop.f32.mrf.mxu2 }
 0x479   : > { %v1753_v51 = vpop.f32.mrf.mxu0 }
 0x47f   : > { %v1780_v4 = vpop.f32.mrf.mxu2 }
 0x481   : > { %v1756_v28 = vpop.f32.mrf.mxu0 }
 0x487   : > { %v1783_v38 = vpop.f32.mrf.mxu2 }
 0x488   : > { %1802 = vmatpush.msra.mxu1 %v1783_v38  ;;  %2014 = vmatpush.msra.mxu3 %v1783_v38 }
 0x489   : > { %v1759_v16 = vpop.f32.mrf.mxu0 }
 0x48a   : > { %1803 = vmatpush.msra.mxu1 %v1780_v4  ;;  %2015 = vmatpush.msra.mxu3 %v1780_v4 }
 0x48c   : > { %1804 = vmatpush.msra.mxu1 %v1777_v22  ;;  %2016 = vmatpush.msra.mxu3 %v1777_v22 }
 0x48e   : > { %1805 = vmatpush.msra.mxu1 %v1774_v49  ;;  %2017 = vmatpush.msra.mxu3 %v1774_v49 }
 0x490   : > { %1806 = vmatpush.msra.mxu1 %v1771_v35  ;;  %2018 = vmatpush.msra.mxu3 %v1771_v35 }
 0x492   : > { %1807 = vmatpush.msra.mxu1 %v1768_v55  ;;  %2019 = vmatpush.msra.mxu3 %v1768_v55 }
 0x494   : > { %1808 = vmatpush.msra.mxu1 %v1765_v21  ;;  %2020 = vmatpush.msra.mxu3 %v1765_v21 }
 0x496   : > { %1809 = vmatpush.msra.mxu1 %v1762_v23  ;;  %2021 = vmatpush.msra.mxu3 %v1762_v23 }
 0x498   : > { %1810 = vmatpush.msra.mxu1 %v1759_v16  ;;  %2022 = vmatpush.msra.mxu3 %v1759_v16 }
 0x49a   : > { %1811 = vmatpush.msra.mxu1 %v1756_v28  ;;  %2023 = vmatpush.msra.mxu3 %v1756_v28 }
 0x49c   : > { %1812 = vmatpush.msra.mxu1 %v1753_v51  ;;  %2024 = vmatpush.msra.mxu3 %v1753_v51 }
 0x49e   : > { %1813 = vmatpush.msra.mxu1 %v1750_v7  ;;  %2025 = vmatpush.msra.mxu3 %v1750_v7 }
 0x4a0   : > { %1814 = vmatpush.msra.mxu1 %v1747_v44  ;;  %2026 = vmatpush.msra.mxu3 %v1747_v44 }
 0x4a2   : > { %1815 = vmatpush.msra.mxu1 %v1744_v56  ;;  %2027 = vmatpush.msra.mxu3 %v1744_v56 }
 0x4a4   : > { %1816 = vmatpush.msra.mxu1 %v1741_v30  ;;  %2028 = vmatpush.msra.mxu3 %v1741_v30 }
 0x4a6   : > { %1817 = vmatpush.msra.mxu1 %v1738_v57  ;;  %2029 = vmatpush.msra.mxu3 %v1738_v57 }
 0x4a7   : > { %1818 = vmatmul.f32.vlgmr.msra.gmra.mxu1 %v1786_v58  ;;  %1842 = vmatmul.f32.vlgmr.msra.gmra.mxu3 %v1794_v25 }
 0x4af   : > { %1821 = vmatmul.f32.gmra.mxu1 %v1787_v2  ;;  %1845 = vmatmul.f32.gmra.mxu3 %v1795_v9 }
 0x4b7   : > { %1824 = vmatmul.f32.gmra.mxu1 %v1788_v18  ;;  %1848 = vmatmul.f32.gmra.mxu3 %v1796_v42 }
 0x4bf   : > { %1827 = vmatmul.f32.gmra.mxu1 %v1789_v47  ;;  %1851 = vmatmul.f32.gmra.mxu3 %v1797_v45 }
 0x4c7   : > { %1830 = vmatmul.f32.gmra.mxu1 %v1790_v13  ;;  %1854 = vmatmul.f32.gmra.mxu3 %v1798_v32 }
 0x4cf   : > { %1833 = vmatmul.f32.gmra.mxu1 %v1791_v43  ;;  %1857 = vmatmul.f32.gmra.mxu3 %v1799_v54 }
 0x4d7   : > { %1836 = vmatmul.f32.gmra.mxu1 %v1792_v24  ;;  %1860 = vmatmul.f32.gmra.mxu3 %v1800_v34 }
 0x4df   : > { %1839 = vmatmul.f32.gmra.mxu1 %v1793_v11  ;;  %1863 = vmatmul.f32.gmra.mxu3 %v1801_v14 }
 0x524   : > { %v1819_v63 = vpop.f32.mrf.mxu1 }
 0x525   : > { %v1867_v50 = vmax.f32 %v1819_v63, 0.0 }
 0x527   : > { %v3796_v52 = vmul.f32 %v1867_v50, %v3754_v12 }
 0x529   : > { %1899 = vst [vmem:[#allocation2 + $0x30] sm:$0xff] %v3796_v52 }
 0x52a   : > { %v1843_v62 = vpop.f32.mrf.mxu3 }
 0x52b   : > { %v1875_v15 = vmax.f32 %v1843_v62, 0.0 }
 0x52c   : > { %v1822_v60 = vpop.f32.mrf.mxu1 }
 0x52d   : > { %v3800_v33 = vmul.f32 %v1875_v15, %v3749_v41  ;;  %v1868_v36 = vmax.f32 %v1822_v60, 0.0 }
 0x52f   : > { %1907 = vst [vmem:[#allocation2 + $0x40] sm:$0xff] %v3800_v33  ;;  %v1884_v37 = vmul.f32 %v1868_v36, %v3760_v8 }
 0x531   : > { %1900 = vst [vmem:[#allocation2] sm:$0xff] %v1884_v37 }
 0x532   : > { %v1846_v3 = vpop.f32.mrf.mxu3 }
 0x533   : > { %v1876_v26 = vmax.f32 %v1846_v3, 0.0 }
 0x534   : > { %v1825_v5 = vpop.f32.mrf.mxu1 }
 0x535   : > { %v1892_v12 = vmul.f32 %v1876_v26, %v3756_v0  ;;  %v1869_v59 = vmax.f32 %v1825_v5, 0.0 }
 0x537   : > { %1908 = vst [vmem:[#allocation2 + $0x20] sm:$0xff] %v1892_v12  ;;  %v1885_v61 = vmul.f32 %v1869_v59, %v3766_v48 }
 0x539   : > { %1901 = vst [vmem:[#allocation2 + $0x58] sm:$0xff] %v1885_v61 }
 0x53a   : > { %v1849_v27 = vpop.f32.mrf.mxu3 }
 0x53b   : > { %v1877_v39 = vmax.f32 %v1849_v27, 0.0 }
 0x53c   : > { %v1828_v41 = vpop.f32.mrf.mxu1 }
 0x53d   : > { %v1893_v23 = vmul.f32 %v1877_v39, %v3747_v20  ;;  %v1870_v57 = vmax.f32 %v1828_v41, 0.0 }
 0x53f   : > { %1909 = vst [vmem:[#allocation2 + $0x10] sm:$0xff] %v1893_v23  ;;  %v1886_v8 = vmul.f32 %v1870_v57, %v3772_v10 }
 0x541   : > { %1902 = vst [vmem:[#allocation2 + $0x18] sm:$0xff] %v1886_v8 }
 0x542   : > { %v1852_v21 = vpop.f32.mrf.mxu3 }
 0x543   : > { %v1878_v30 = vmax.f32 %v1852_v21, 0.0 }
 0x544   : > { %v1831_v55 = vpop.f32.mrf.mxu1 }
 0x545   : > { %v1894_v0 = vmul.f32 %v1878_v30, %v3752_v19  ;;  %v1871_v56 = vmax.f32 %v1831_v55, 0.0 }
 0x547   : > { %1910 = vst [vmem:[#allocation2 + $0x38] sm:$0xff] %v1894_v0  ;;  %v1887_v48 = vmul.f32 %v1871_v56, %v3778_v17 }
 0x549   : > { %1903 = vst [vmem:[#allocation2 + $0x50] sm:$0xff] %v1887_v48 }
 0x54a   : > { %v1855_v35 = vpop.f32.mrf.mxu3 }
 0x54b   : > { %v1879_v44 = vmax.f32 %v1855_v35, 0.0 }
 0x54c   : > { %v1834_v49 = vpop.f32.mrf.mxu1 }
 0x54d   : > { %v1895_v20 = vmul.f32 %v1879_v44, %v3764_v29  ;;  %v1872_v22 = vmax.f32 %v1834_v49, 0.0 }
 0x54f   : > { %1911 = vst [vmem:[#allocation2 + $0x60] sm:$0xff] %v1895_v20  ;;  %v1888_v10 = vmul.f32 %v1872_v22, %v3782_v6 }
 0x551   : > { %1904 = vst [vmem:[#allocation2 + $0x68] sm:$0xff] %v1888_v10 }
 0x552   : > { %v1858_v7 = vpop.f32.mrf.mxu3 }
 0x553   : > { %v1880_v4 = vmax.f32 %v1858_v7, 0.0 }
 0x554   : > { %v1837_v51 = vpop.f32.mrf.mxu1 }
 0x555   : > { %v1896_v19 = vmul.f32 %v1880_v4, %v3770_v31  ;;  %v1873_v38 = vmax.f32 %v1837_v51, 0.0 }
 0x557   : > { %1912 = vst [vmem:[#allocation2 + $0x70] sm:$0xff] %v1896_v19  ;;  %v1889_v17 = vmul.f32 %v1873_v38, %v3788_v40 }
 0x559   : > { %1905 = vst [vmem:[#allocation2 + $0x8] sm:$0xff] %v1889_v17 }
 0x55a   : > { %v1861_v28 = vpop.f32.mrf.mxu3 }
 0x55b   : > { %v1881_v16 = vmax.f32 %v1861_v28, 0.0 }
 0x55c   : > { %v1840_v58 = vpop.f32.mrf.mxu1 }
 0x55d   : > { %v1897_v29 = vmul.f32 %v1881_v16, %v3776_v1  ;;  %v1874_v25 = vmax.f32 %v1840_v58, 0.0 }
 0x55f   : > { %1913 = vst [vmem:[#allocation2 + $0x78] sm:$0xff] %v1897_v29  ;;  %v1890_v6 = vmul.f32 %v1874_v25, %v3792_v46 }
 0x561   : > { %1906 = vst [vmem:[#allocation2 + $0x48] sm:$0xff] %v1890_v6 }
 0x562   : > { %v1864_v2 = vpop.f32.mrf.mxu3 }
 0x563   : > { %v1882_v9 = vmax.f32 %v1864_v2, 0.0  ;;  %1918 = sbr.rel (%p1992_p5) target bundleno = 1400 (0x578), region = 48 }
 0x565   : > { %v1898_v18 = vmul.f32 %v1882_v9, %v3786_v53 }
 0x567   : > { %1914 = vst [vmem:[#allocation2 + $0x28] sm:$0xff] %v1898_v18 }
 0x568   : > { %1919 = vst [vmem:[#allocation4] sm:$0xff] %v3796_v52 }
 0x569   : > { %1920 = vst [vmem:[#allocation4 + $0x8] sm:$0xff] %v1884_v37 }
 0x56a   : > { %1921 = vst [vmem:[#allocation4 + $0x10] sm:$0xff] %v1885_v61 }
 0x56b   : > { %1922 = vst [vmem:[#allocation4 + $0x18] sm:$0xff] %v1886_v8 }
 0x56c   : > { %1923 = vst [vmem:[#allocation4 + $0x20] sm:$0xff] %v1887_v48 }
 0x56d   : > { %1924 = vst [vmem:[#allocation4 + $0x28] sm:$0xff] %v1888_v10 }
 0x56e   : > { %1925 = vst [vmem:[#allocation4 + $0x30] sm:$0xff] %v1889_v17 }
 0x56f   : > { %1926 = vst [vmem:[#allocation4 + $0x38] sm:$0xff] %v1890_v6 }
 0x570   : > { %1927 = vst [vmem:[#allocation4 + $0x40] sm:$0xff] %v3800_v33 }
 0x571   : > { %1928 = vst [vmem:[#allocation4 + $0x48] sm:$0xff] %v1892_v12 }
 0x572   : > { %1929 = vst [vmem:[#allocation4 + $0x50] sm:$0xff] %v1893_v23 }
 0x573   : > { %1930 = vst [vmem:[#allocation4 + $0x58] sm:$0xff] %v1894_v0 }
 0x574   : > { %1931 = vst [vmem:[#allocation4 + $0x60] sm:$0xff] %v1895_v20 }
 0x575   : > { %1932 = vst [vmem:[#allocation4 + $0x68] sm:$0xff] %v1896_v19 }
 0x576   : > { %1933 = vst [vmem:[#allocation4 + $0x70] sm:$0xff] %v1897_v29 }
 0x577   : > { %1934 = vst [vmem:[#allocation4 + $0x78] sm:$0xff] %v1898_v18 }
 0x578 PF: > { %p2034_p6 = scmp.eq.s32.totalorder %s2203_s19, 1  ;;  %s2164_s6 = smov [#allocation4]  }
 0x579   : > { %s1940_s15 = sshll.u32 %s2164_s6, 4  ;;  %s1942_s20 = sshll.u32 %s3832_s5, 4  ;;  %s1941_s15 = int_to_ptr.vmem [resolvable:$true] %s1940_s15  ;;  %s1943_s20 = int_to_ptr.hbm [resolvable:$true] %s1942_s20 }
 0x57a   : > { %s2165_s21 = smov 128   ;;  %s2166_s22 = smov 8  }
 0x57b   : > { %2031 = dma.vmem_to_hbm [thread:$0]  (%p2034_p6), %s1941_s15, 2048, %s1943_s20, [#allocation5], %s2165_s21, %s2165_s21, %s2166_s22  }
 0x57c   : > { %2148 = dma.done.wait (%p2034_p6), [#allocation5], 2048  }
 0x57d   : > { %2150 = vsyncadd (%p2034_p6), [#allocation5], 4294965248 }
 0x57e PF: > { %s16_s18 = sadd.s32 1, %s2153_s18  }
 0x57f   : > { %p13_p7 = scmp.ge.s32.totalorder %s16_s18, 4  }
 0x581   :  { %15 = sbr.rel (!%p13_p7) target bundleno = 1 (0x1), region = 75 }
 0x586   :  { %1959 = vsyncpa [#allocation5], 1 }
 0x587   :  { %1961 = vsyncpa [#allocation5 + $0x1], 1 }

</bundles_post_ra>
